<compile_context>
chip_gen: v7x
topology: tpu7x:2x2x1
jax: 0.10.0
libtpu: 0.0.40
codegen_flags: <defaults>
</compile_context>

<pallas_src>
import functools

import numpy as np
import jax
import jax.numpy as jnp
from jax.experimental import pallas as pl
from jax.experimental.pallas import tpu as pltpu


def _round_up(x, m):
    return ((x + m - 1) // m) * m


def _cdiv(a, b):
    return (a + b - 1) // b


# ----------------------------------------------------------------------------- kernels

def mlp_kernel(x_ref, w1_ref, b1_ref, w2_ref, b2_ref, w3_ref, b3_ref, o_ref,
               *, compute_dtype):
    """Fused 3-layer MLP for one batch tile (all weights resident in VMEM).

    x arrives in its HBM dtype and is cast to the matmul dtype on the VPU, so the
    wrapper never does a separate cast pass over HBM. Accumulation / bias / ReLU in f32.
    """
    x = x_ref[...].astype(compute_dtype)                                  # [tb, K]
    h1 = jnp.dot(x, w1_ref[...], preferred_element_type=jnp.float32)     # [tb, 512] f32
    h1 = jnp.maximum(h1 + b1_ref[...], 0.0).astype(compute_dtype)

    h2 = jnp.dot(h1, w2_ref[...], preferred_element_type=jnp.float32)    # [tb, 1024] f32
    h2 = jnp.maximum(h2 + b2_ref[...], 0.0).astype(compute_dtype)

    out = jnp.dot(h2, w3_ref[...], preferred_element_type=jnp.float32)   # [tb, Np] f32
    o_ref[...] = (out + b3_ref[...]).astype(o_ref.dtype)


def mlp_kernel_ktiled(x_ref, w1_ref, b1_ref, w2_ref, b2_ref, w3_ref, b3_ref, o_ref,
                      acc_ref, *, compute_dtype):
    """Layer-1 K-tiled variant for wide inputs: accumulate x @ w1 over the second
    ("arbitrary") grid axis in an f32 VMEM scratch, run layers 2/3 at the last K step."""
    k = pl.program_id(1)

    @pl.when(k == 0)
    def _():
        acc_ref[...] = jnp.zeros_like(acc_ref)

    x = x_ref[...].astype(compute_dtype)
    acc_ref[...] += jnp.dot(x, w1_ref[...], preferred_element_type=jnp.float32)

    @pl.when(k == pl.num_programs(1) - 1)
    def _():
        h1 = jnp.maximum(acc_ref[...] + b1_ref[...], 0.0).astype(compute_dtype)
        h2 = jnp.dot(h1, w2_ref[...], preferred_element_type=jnp.float32)
        h2 = jnp.maximum(h2 + b2_ref[...], 0.0).astype(compute_dtype)
        out = jnp.dot(h2, w3_ref[...], preferred_element_type=jnp.float32)
        o_ref[...] = (out + b3_ref[...]).astype(o_ref.dtype)


# ----------------------------------------------------------------------------- wrapper

# Past this resident-w1 size, switch to the K-tiled layer-1 path (protects VMEM,
# especially v7x's 64 MiB physical budget, for very wide inputs).
_W1_RESIDENT_LIMIT_BYTES = 4 * 1024 * 1024


def _pick_tile_b(B, k_width, x_itemsize):
    """Batch-tile rows: big enough to amortize the ~0.35us/step grid overhead, split
    into >=2 (even #) steps for large B so v7x's two TensorCores both get work, and
    bounded so the double-buffered x tile stays under ~8 MiB of VMEM."""
    cap = (8 * 1024 * 1024) // (2 * k_width * x_itemsize)
    cap = min(1024, max(8, (cap // 8) * 8))
    if B <= 512:
        # Small batches: one step; splitting would just double the per-step overhead
        # on the single-TC generations (v5e/v6e).
        return min(cap, max(8, _round_up(B, 8)))
    n_steps = max(2, _cdiv(B, cap))
    if n_steps % 2:
        n_steps += 1  # even step count -> balanced split across v7x's 2 TensorCores
    return min(cap, max(8, _round_up(_cdiv(B, n_steps), 8)))


def mlp_forward(x, params, *, tile_b=None, compute_dtype=jnp.bfloat16):
    """Forward pass of the MLP.

    x: [B, input_size]. params: dict of w1,b1,w2,b2,w3,b3 (f32, [in, out] layout).
    compute_dtype: MXU operand dtype (explicit precision choice). bf16 is ~1e-2 rel.
    error vs the f32 PyTorch reference; pass jnp.float32 for full precision.
    """
    B, in_size = x.shape
    w1, b1 = params["w1"], params["b1"]
    w2, b2 = params["w2"], params["b2"]
    w3, b3 = params["w3"], params["b3"]
    h1_size = w1.shape[1]          # 512
    h2_size = w2.shape[1]          # 1024
    out_size = w3.shape[1]

    cd_itemsize = np.dtype(compute_dtype).itemsize

    # Lane-dense K/N: pad to multiples of 128 only when not already aligned.
    in_pad = _round_up(max(in_size, 128), 128)
    out_pad = _round_up(max(out_size, 128), 128)

    # Layer-1 residency decision and K tile.
    k_tiled = in_pad * h1_size * cd_itemsize > _W1_RESIDENT_LIMIT_BYTES
    if k_tiled:
        tile_k = next(c for c in (512, 256, 128) if in_pad % c == 0)
        x_tile_k = tile_k
    else:
        tile_k = None
        x_tile_k = in_pad

    if tile_b is None:
        tile_b = _pick_tile_b(B, x_tile_k, x.dtype.itemsize)
    tile_b = max(8, _round_up(tile_b, 8))
    B_pad = _round_up(B, tile_b)

    # x stays in its own dtype (cast on the VPU inside the kernel). Pad only if needed
    # (single fused pad over batch + feature dims); zero extra HBM passes when aligned.
    if B_pad != B or in_pad != in_size:
        x_p = jnp.pad(x, ((0, B_pad - B), (0, in_pad - in_size)))
    else:
        x_p = x

    w1_p = w1 if in_pad == in_size else jnp.pad(w1, ((0, in_pad - in_size), (0, 0)))
    w3_p = w3 if out_pad == out_size else jnp.pad(w3, ((0, 0), (0, out_pad - out_size)))
    b3_p = b3 if out_pad == out_size else jnp.pad(b3, (0, out_pad - out_size))
    w1_p = w1_p.astype(compute_dtype)
    w2_p = w2.astype(compute_dtype)
    w3_p = w3_p.astype(compute_dtype)
    b1_p = b1.reshape(1, h1_size).astype(jnp.float32)
    b2_p = b2.reshape(1, h2_size).astype(jnp.float32)
    b3_p = b3_p.reshape(1, out_pad).astype(jnp.float32)

    flops = 2 * B_pad * (in_pad * h1_size + h1_size * h2_size + h2_size * out_pad)
    bytes_accessed = (
        x_p.size * x_p.dtype.itemsize
        + (w1_p.size + w2_p.size + w3_p.size) * cd_itemsize
        + (b1_p.size + b2_p.size + b3_p.size) * 4
        + B_pad * out_pad * x.dtype.itemsize
    )
    cost = pl.CostEstimate(flops=flops, transcendentals=0, bytes_accessed=bytes_accessed)

    out_shape = jax.ShapeDtypeStruct((B_pad, out_pad), x.dtype)

    if not k_tiled:
        # Fused path: all weights resident, 1-D grid over batch tiles.
        kernel = functools.partial(mlp_kernel, compute_dtype=compute_dtype)

        def const_spec(shape):
            return pl.BlockSpec(shape, lambda i: (0, 0))

        grid_spec = pltpu.PrefetchScalarGridSpec(
            num_scalar_prefetch=0,
            grid=(B_pad // tile_b,),
            in_specs=[
                pl.BlockSpec((tile_b, in_pad), lambda i: (i, 0)),   # x tile (pipelined)
                const_spec((in_pad, h1_size)),                       # w1 (resident)
                const_spec((1, h1_size)),                            # b1
                const_spec((h1_size, h2_size)),                      # w2 (resident)
                const_spec((1, h2_size)),                            # b2
                const_spec((h2_size, out_pad)),                      # w3 (resident)
                const_spec((1, out_pad)),                            # b3
            ],
            out_specs=pl.BlockSpec((tile_b, out_pad), lambda i: (i, 0)),
        )
        dim_sem = ("parallel",)
    else:
        # Wide-input path: 2-D grid (batch tiles x K tiles), f32 accumulator for layer 1.
        kernel = functools.partial(mlp_kernel_ktiled, compute_dtype=compute_dtype)

        def const_spec2(shape):
            return pl.BlockSpec(shape, lambda i, k: (0, 0))

        grid_spec = pltpu.PrefetchScalarGridSpec(
            num_scalar_prefetch=0,
            grid=(B_pad // tile_b, in_pad // tile_k),
            in_specs=[
                pl.BlockSpec((tile_b, tile_k), lambda i, k: (i, k)),   # x tile
                pl.BlockSpec((tile_k, h1_size), lambda i, k: (k, 0)),  # w1 K-slice
                const_spec2((1, h1_size)),                             # b1
                const_spec2((h1_size, h2_size)),                       # w2 (resident)
                const_spec2((1, h2_size)),                             # b2
                const_spec2((h2_size, out_pad)),                       # w3 (resident)
                const_spec2((1, out_pad)),                             # b3
            ],
            out_specs=pl.BlockSpec((tile_b, out_pad), lambda i, k: (i, 0)),
            scratch_shapes=[pltpu.VMEM((tile_b, h1_size), jnp.float32)],
        )
        dim_sem = ("parallel", "arbitrary")

    # TODO(synk): add an N-tiled layer-3 path (and bundle-dump check of x pipelining on
    # v5e, per review) for very large output_size; not needed at these hidden sizes.
    out_padded = pl.pallas_call(
        kernel,
        out_shape=out_shape,
        grid_spec=grid_spec,
        compiler_params=pltpu.CompilerParams(
            dimension_semantics=dim_sem,
            vmem_limit_bytes=32 * 1024 * 1024,
        ),
        cost_estimate=cost,
    )(x_p, w1_p, b1_p, w2_p, b2_p, w3_p, b3_p)

    if B_pad != B or out_pad != out_size:
        out_padded = out_padded[:B, :out_size]
    return out_padded


# ----------------------------------------------------------------------------- helpers

def init_mlp_params(key, input_size, output_size, dtype=jnp.float32):
    """Deterministic init mimicking PyTorch nn.Linear default (U[-1/sqrt(fan_in), 1/sqrt(fan_in)])."""
    sizes = [(input_size, 512), (512, 1024), (1024, output_size)]
    params = {}
    for idx, (fan_in, fan_out) in enumerate(sizes, start=1):
        key, kw, kb = jax.random.split(key, 3)
        bound = 1.0 / jnp.sqrt(jnp.array(fan_in, dtype=dtype))
        params[f"w{idx}"] = jax.random.uniform(
            kw, (fan_in, fan_out), dtype=dtype, minval=-bound, maxval=bound)
        params[f"b{idx}"] = jax.random.uniform(
            kb, (fan_out,), dtype=dtype, minval=-bound, maxval=bound)
    return params


def mlp_reference(x, params):
    h1 = jnp.maximum(x @ params["w1"] + params["b1"], 0.0)
    h2 = jnp.maximum(h1 @ params["w2"] + params["b2"], 0.0)
    return h2 @ params["w3"] + params["b3"]


if __name__ == "__main__":
    key = jax.random.PRNGKey(0)
    k_param, k_x = jax.random.split(key)

    batch = 8
    input_size = 32
    output_size = 16

    params = init_mlp_params(k_param, input_size, output_size)
    x = jax.random.normal(k_x, (batch, input_size), dtype=jnp.float32)

    out = mlp_forward(x, params)
    out = jax.block_until_ready(out)

    # correctness check vs pure-JAX f32 reference (loose tol: bf16 matmul operands)
    ref = jax.block_until_ready(mlp_reference(x, params))
    assert out.shape == (batch, output_size)
    assert jnp.allclose(out, ref, atol=5e-2, rtol=5e-2), "mismatch vs reference"

    print("KERNEL_OK")
</pallas_src>

<mosaic_0001>
module attributes {stable_mosaic.version = 11 : i64} {
  func.func @mlp_kernel(%arg0: i32, %arg1: memref<8x128xf32, #tpu.memory_space<vmem>>, %arg2: memref<128x512xbf16, #tpu.memory_space<vmem>>, %arg3: memref<1x512xf32, #tpu.memory_space<vmem>>, %arg4: memref<512x1024xbf16, #tpu.memory_space<vmem>>, %arg5: memref<1x1024xf32, #tpu.memory_space<vmem>>, %arg6: memref<1024x128xbf16, #tpu.memory_space<vmem>>, %arg7: memref<1x128xf32, #tpu.memory_space<vmem>>, %arg8: memref<8x128xf32, #tpu.memory_space<vmem>>) attributes {dimension_semantics = [#tpu.dimension_semantics<parallel>], iteration_bounds = array<i64: 1>, scalar_prefetch = 0 : i64, scratch_operands = 0 : i64, tpu.core_type = #tpu.core_type<tc>, window_params = [{transform_indices = @transform_0, window_bounds = array<i64: 8, 128>}, {pipeline_mode = #tpu.pipeline_mode<synchronous>, transform_indices = @transform_1, window_bounds = array<i64: 128, 512>}, {pipeline_mode = #tpu.pipeline_mode<synchronous>, transform_indices = @transform_2, window_bounds = array<i64: 1, 512>}, {pipeline_mode = #tpu.pipeline_mode<synchronous>, transform_indices = @transform_3, window_bounds = array<i64: 512, 1024>}, {pipeline_mode = #tpu.pipeline_mode<synchronous>, transform_indices = @transform_4, window_bounds = array<i64: 1, 1024>}, {pipeline_mode = #tpu.pipeline_mode<synchronous>, transform_indices = @transform_5, window_bounds = array<i64: 1024, 128>}, {pipeline_mode = #tpu.pipeline_mode<synchronous>, transform_indices = @transform_6, window_bounds = array<i64: 1, 128>}, {transform_indices = @transform_7, window_bounds = array<i64: 8, 128>}]} {
    %c0 = arith.constant 0 : index
    %c0_0 = arith.constant 0 : index
    %0 = vector.load %arg1[%c0, %c0_0] : memref<8x128xf32, #tpu.memory_space<vmem>>, vector<8x128xf32>
    %1 = arith.truncf %0 : vector<8x128xf32> to vector<8x128xbf16>
    %c0_1 = arith.constant 0 : index
    %c0_2 = arith.constant 0 : index
    %2 = vector.load %arg2[%c0_1, %c0_2] : memref<128x512xbf16, #tpu.memory_space<vmem>>, vector<128x512xbf16>
    %cst = arith.constant dense<0.000000e+00> : vector<8x512xf32>
    %3 = tpu.matmul %1, %2, %cst {dimension_numbers = #tpu.dot_dimension_numbers<[1], [0], [0], [1], [0, 0, 1, 1], [], []>} : vector<8x128xbf16>, vector<128x512xbf16>, vector<8x512xf32> -> vector<8x512xf32>
    %c0_3 = arith.constant 0 : index
    %c0_4 = arith.constant 0 : index
    %4 = vector.load %arg3[%c0_3, %c0_4] : memref<1x512xf32, #tpu.memory_space<vmem>>, vector<1x512xf32>
    %5 = vector.broadcast %4 : vector<1x512xf32> to vector<8x512xf32>
    %6 = arith.addf %3, %5 : vector<8x512xf32>
    %cst_5 = arith.constant 0.000000e+00 : f32
    %7 = vector.broadcast %cst_5 : f32 to vector<8x512xf32>
    %8 = arith.maximumf %6, %7 : vector<8x512xf32>
    %9 = arith.truncf %8 : vector<8x512xf32> to vector<8x512xbf16>
    %c0_6 = arith.constant 0 : index
    %c0_7 = arith.constant 0 : index
    %10 = vector.load %arg4[%c0_6, %c0_7] : memref<512x1024xbf16, #tpu.memory_space<vmem>>, vector<512x1024xbf16>
    %cst_8 = arith.constant dense<0.000000e+00> : vector<8x1024xf32>
    %11 = tpu.matmul %9, %10, %cst_8 {dimension_numbers = #tpu.dot_dimension_numbers<[1], [0], [0], [1], [0, 0, 1, 1], [], []>} : vector<8x512xbf16>, vector<512x1024xbf16>, vector<8x1024xf32> -> vector<8x1024xf32>
    %c0_9 = arith.constant 0 : index
    %c0_10 = arith.constant 0 : index
    %12 = vector.load %arg5[%c0_9, %c0_10] : memref<1x1024xf32, #tpu.memory_space<vmem>>, vector<1x1024xf32>
    %13 = vector.broadcast %12 : vector<1x1024xf32> to vector<8x1024xf32>
    %14 = arith.addf %11, %13 : vector<8x1024xf32>
    %cst_11 = arith.constant 0.000000e+00 : f32
    %15 = vector.broadcast %cst_11 : f32 to vector<8x1024xf32>
    %16 = arith.maximumf %14, %15 : vector<8x1024xf32>
    %17 = arith.truncf %16 : vector<8x1024xf32> to vector<8x1024xbf16>
    %c0_12 = arith.constant 0 : index
    %c0_13 = arith.constant 0 : index
    %18 = vector.load %arg6[%c0_12, %c0_13] : memref<1024x128xbf16, #tpu.memory_space<vmem>>, vector<1024x128xbf16>
    %cst_14 = arith.constant dense<0.000000e+00> : vector<8x128xf32>
    %19 = tpu.matmul %17, %18, %cst_14 {dimension_numbers = #tpu.dot_dimension_numbers<[1], [0], [0], [1], [0, 0, 1, 1], [], []>} : vector<8x1024xbf16>, vector<1024x128xbf16>, vector<8x128xf32> -> vector<8x128xf32>
    %c0_15 = arith.constant 0 : index
    %c0_16 = arith.constant 0 : index
    %20 = vector.load %arg7[%c0_15, %c0_16] : memref<1x128xf32, #tpu.memory_space<vmem>>, vector<1x128xf32>
    %21 = vector.broadcast %20 : vector<1x128xf32> to vector<8x128xf32>
    %22 = arith.addf %19, %21 : vector<8x128xf32>
    %c0_17 = arith.constant 0 : index
    %c0_18 = arith.constant 0 : index
    %23 = vector.load %arg8[%c0_17, %c0_18] : memref<8x128xf32, #tpu.memory_space<vmem>>, vector<8x128xf32>
    tpu.vector_store %arg8[%c0_17, %c0_18], %22 {strides = array<i32>} : memref<8x128xf32, #tpu.memory_space<vmem>>, vector<8x128xf32>,
    return
  }
  func.func @transform_0(%arg0: i32) -> (i32, i32) {
    %c0_i32 = arith.constant 0 : i32
    %c0_i32_0 = arith.constant 0 : i32
    return %arg0, %c0_i32 : i32, i32
  }
  func.func @transform_1(%arg0: i32) -> (i32, i32) {
    %c0_i32 = arith.constant 0 : i32
    %c0_i32_0 = arith.constant 0 : i32
    %c0_i32_1 = arith.constant 0 : i32
    return %c0_i32, %c0_i32_0 : i32, i32
  }
  func.func @transform_2(%arg0: i32) -> (i32, i32) {
    %c0_i32 = arith.constant 0 : i32
    %c0_i32_0 = arith.constant 0 : i32
    %c0_i32_1 = arith.constant 0 : i32
    return %c0_i32, %c0_i32_0 : i32, i32
  }
  func.func @transform_3(%arg0: i32) -> (i32, i32) {
    %c0_i32 = arith.constant 0 : i32
    %c0_i32_0 = arith.constant 0 : i32
    %c0_i32_1 = arith.constant 0 : i32
    return %c0_i32, %c0_i32_0 : i32, i32
  }
  func.func @transform_4(%arg0: i32) -> (i32, i32) {
    %c0_i32 = arith.constant 0 : i32
    %c0_i32_0 = arith.constant 0 : i32
    %c0_i32_1 = arith.constant 0 : i32
    return %c0_i32, %c0_i32_0 : i32, i32
  }
  func.func @transform_5(%arg0: i32) -> (i32, i32) {
    %c0_i32 = arith.constant 0 : i32
    %c0_i32_0 = arith.constant 0 : i32
    %c0_i32_1 = arith.constant 0 : i32
    return %c0_i32, %c0_i32_0 : i32, i32
  }
  func.func @transform_6(%arg0: i32) -> (i32, i32) {
    %c0_i32 = arith.constant 0 : i32
    %c0_i32_0 = arith.constant 0 : i32
    %c0_i32_1 = arith.constant 0 : i32
    return %c0_i32, %c0_i32_0 : i32, i32
  }
  func.func @transform_7(%arg0: i32) -> (i32, i32) {
    %c0_i32 = arith.constant 0 : i32
    %c0_i32_0 = arith.constant 0 : i32
    return %arg0, %c0_i32 : i32, i32
  }
}

</mosaic_0001>

<bundles_post_ra>
// kernel: tpu_custom_call.1
= control target key start
LH: loop header
LB: loop body
LE: loop exit
PB: predicated region body
PF: predicated region fallthrough
CT: control target
= control target key end

     0   :  { %12 = vsyncpa [#allocation3], 0  ;;  %s3903_s0 = inlined_call_operand.hbm [shape: f32[8,128], index: 0, kind: input, shape index: {}]   ;;  %s3904_s1 = inlined_call_operand.hbm [shape: bf16[128,512], index: 1, kind: input, shape index: {}]   ;;  %s3905_s2 = inlined_call_operand.vmem [shape: f32[1,512], index: 2, kind: input, shape index: {}]   ;;  %s3906_s3 = inlined_call_operand.hbm [shape: bf16[512,1024], index: 3, kind: input, shape index: {}]   ;;  %s3907_s4 = inlined_call_operand.vmem [shape: f32[1,1024], index: 4, kind: input, shape index: {}]   ;;  %s3908_s5 = inlined_call_operand.hbm [shape: bf16[1024,128], index: 5, kind: input, shape index: {}]   ;;  %s3909_s6 = inlined_call_operand.vmem [shape: f32[1,128], index: 6, kind: input, shape index: {}]   ;;  %s3910_s7 = inlined_call_operand.hbm [shape: f32[8,128], index: 7, kind: output, shape index: {}]  }
   0x1   :  { %13 = vsyncpa [#allocation6], 0 }
   0x2   :  { %14 = vsyncpa [#allocation9], 0 }
   0x3   :  { %15 = vsyncpa [#allocation4], 0  ;;  %s3713_s24 = smov [#allocation5]   ;;  %s3595_s28 = scalar_lea.hbm %s3904_s1, 4096 }
   0x4   :  { %s31_s25 = sshll.u32 %s3713_s24, 4  ;;  %p3596_p0 = scmp.ne.s32.totalorder %s3904_s1, %s3595_s28  ;;  %s32_s25 = int_to_ptr.vmem [resolvable:$true] %s31_s25 }
   0x5   :  { %p3599_p1 = scmp.lt.u32.totalorder %s3595_s28, %s3904_s1 }
   0x7   :  { %p3601_p2 = pnand %p3599_p1, %p3596_p0 }
   0x9   :  { %3604 = shalt.err (!%p3601_p2)
}
   0xa   :  { %s3605_s10 = scalar_lea.vmem %s32_s25, 4096  ;;  %p3610_p4 = scmp.lt.s32.totalorder %s32_s25, %s32_s25 }
   0xb   :  { %p3606_p3 = scmp.ne.s32.totalorder %s32_s25, %s3605_s10  ;;  %p3611_p5 = scmp.lt.s32.totalorder %s3605_s10, %s3605_s10 }
   0xd   :  { %p3612_p6 = por %p3611_p5, %p3610_p4 }
   0xf   :  { %p3613_p7 = pnand %p3612_p6, %p3606_p3 }
  0x11   :  { %3616 = shalt.err (!%p3613_p7)
}
  0x12   :  { %s3714_s11 = smov 256   ;;  %s3715_s12 = smov 16  }
  0x13   :  { %37 = dma.hbm_to_vmem [thread:$0]  %s3904_s1, 4096, %s32_s25, [#allocation6], %s3714_s11, %s3714_s11, %s3715_s12  }
  0x14   :  { %s3716_s15 = smov [#allocation2]   ;;  %s3717_s17 = smov [#allocation7]  }
  0x15   :  { %s22_s16 = sshll.u32 %s3716_s15, 4  ;;  %s45_s18 = sshll.u32 %s3717_s17, 4  ;;  %s23_s16 = int_to_ptr.vmem [resolvable:$true] %s22_s16  ;;  %s46_s18 = int_to_ptr.vmem [resolvable:$true] %s45_s18 }
  0x16   :  { %s3617_s21 = scalar_lea.hbm %s3903_s0, 128 }
  0x17   :  { %p3618_p8 = scmp.ne.s32.totalorder %s3903_s0, %s3617_s21  ;;  %p3621_p9 = scmp.lt.u32.totalorder %s3617_s21, %s3903_s0 }
  0x19   :  { %p3623_p10 = pnand %p3621_p9, %p3618_p8 }
  0x1b   :  { %3626 = shalt.err (!%p3623_p10)
}
  0x1c   :  { %s3627_s1 = scalar_lea.vmem %s23_s16, 128  ;;  %p3632_p12 = scmp.lt.s32.totalorder %s23_s16, %s23_s16 }
  0x1d   :  { %p3628_p11 = scmp.ne.s32.totalorder %s23_s16, %s3627_s1  ;;  %p3633_p13 = scmp.lt.s32.totalorder %s3627_s1, %s3627_s1 }
  0x1f   :  { %p3634_p0 = por %p3633_p13, %p3632_p12 }
  0x21   :  { %p3635_p1 = pnand %p3634_p0, %p3628_p11 }
  0x23   :  { %3638 = shalt.err (!%p3635_p1)
}
  0x24   :  { %25 = dma.hbm_to_vmem [thread:$0]  %s3903_s0, 128, %s23_s16, [#allocation3]  }
  0x25   :  { %s3639_s30 = scalar_lea.hbm %s3906_s3, 32768 }
  0x26   :  { %p3640_p2 = scmp.ne.s32.totalorder %s3906_s3, %s3639_s30  ;;  %p3643_p3 = scmp.lt.u32.totalorder %s3639_s30, %s3906_s3 }
  0x28   :  { %p3645_p4 = pnand %p3643_p3, %p3640_p2 }
  0x2a   :  { %3648 = shalt.err (!%p3645_p4)
}
  0x2b   :  { %s3649_s12 = scalar_lea.vmem %s46_s18, 32768  ;;  %p3654_p6 = scmp.lt.s32.totalorder %s46_s18, %s46_s18 }
  0x2c   :  { %p3650_p5 = scmp.ne.s32.totalorder %s46_s18, %s3649_s12  ;;  %p3655_p7 = scmp.lt.s32.totalorder %s3649_s12, %s3649_s12 }
  0x2e   :  { %p3656_p8 = por %p3655_p7, %p3654_p6 }
  0x30   :  { %p3657_p9 = pnand %p3656_p8, %p3650_p5 }
  0x32   :  { %3660 = shalt.err (!%p3657_p9)
}
  0x33   :  { %s3718_s0 = smov 512   ;;  %s3719_s13 = smov 32  }
  0x34   :  { %51 = dma.hbm_to_vmem [thread:$0]  %s3906_s3, 32768, %s46_s18, [#allocation6], %s3718_s0, %s3718_s0, %s3719_s13  }
  0x35   :  { %s3720_s16 = smov [#allocation8]   ;;  %s3661_s21 = scalar_lea.hbm %s3908_s5, 8192 }
  0x36   :  { %s59_s17 = sshll.u32 %s3720_s16, 4  ;;  %p3662_p10 = scmp.ne.s32.totalorder %s3908_s5, %s3661_s21  ;;  %s60_s17 = int_to_ptr.vmem [resolvable:$true] %s59_s17 }
  0x37   :  { %p3665_p11 = scmp.lt.u32.totalorder %s3661_s21, %s3908_s5 }
  0x39   :  { %p3667_p12 = pnand %p3665_p11, %p3662_p10 }
  0x3b   :  { %3670 = shalt.err (!%p3667_p12)
}
  0x3c   :  { %s3671_s1 = scalar_lea.vmem %s60_s17, 8192  ;;  %p3676_p0 = scmp.lt.s32.totalorder %s60_s17, %s60_s17 }
  0x3d   :  { %p3672_p13 = scmp.ne.s32.totalorder %s60_s17, %s3671_s1  ;;  %p3677_p1 = scmp.lt.s32.totalorder %s3671_s1, %s3671_s1 }
  0x3f   :  { %p3678_p2 = por %p3677_p1, %p3676_p0 }
  0x41   :  { %p3679_p3 = pnand %p3678_p2, %p3672_p13 }
  0x43   :  { %3682 = shalt.err (!%p3679_p3)
}
  0x44   :  { %s3721_s3 = smov 64   ;;  %s3722_s18 = smov 4  }
  0x45   :  { %65 = dma.hbm_to_vmem [thread:$0]  %s3908_s5, 8192, %s60_s17, [#allocation9], %s3721_s3, %s3721_s3, %s3722_s18  }
  0x46   :  { %3705 = dma.done.wait [#allocation3], 128  }
  0x47   :  { %3706 = vsyncadd [#allocation3], 4294967168 }
  0x48   :  { %3707 = dma.done.wait [#allocation6], 36864  }
  0x49   :  { %3708 = vsyncadd [#allocation6], 4294930432 }
  0x4a   :  { %3709 = dma.done.wait [#allocation9], 8192  }
  0x4b   :  { %3710 = vsyncadd [#allocation9], 4294959104  ;;  %v3723_v0 = vmov 0   ;;  %v3483_v1 = vld [vmem:[#allocation5 + $0x4] ss:$16 sps:$4 sm:$0xff]   ;;  %v81_v29 = vld [vmem:[#allocation2] sm:$0xff] }
  0x4c   :  { %329 = vmatprep.mubr.bf16.mxu0 %v3723_v0  ;;  %370 = vmatprep.mubr.bf16.mxu1 %v3723_v0  ;;  %v3485_v2 = vld [vmem:[#allocation5] ss:$16 sps:$4 sm:$0xff]   ;;  %v3486_v3 = vld [vmem:[#allocation5 + $0x24] ss:$16 sps:$4 sm:$0xff]   ;;  %v3507_v10 = vld [vmem:[#allocation5 + $0xc] ss:$16 sps:$4 sm:$0xff]   ;;  %v82_v34 = vpack.c.bf16 %v81_v29, %v81_v29 }
  0x4d   :  { %297 = vmatprep.subr.bf16.mxu0 %v3483_v1  ;;  %v3488_v4 = vld [vmem:[#allocation5 + $0x20] ss:$16 sps:$4 sm:$0xff]   ;;  %v3489_v5 = vld [vmem:[#allocation5 + $0x44] ss:$16 sps:$4 sm:$0xff]   ;;  %v3509_v11 = vld [vmem:[#allocation5 + $0x8] ss:$16 sps:$4 sm:$0xff]   ;;  %338 = vmatprep.subr.bf16.mxu1 %v3507_v10 }
  0x4e   :  { %298 = vmatpush1.bf16.msra.mxu0 %v3485_v2  ;;  %v3491_v6 = vld [vmem:[#allocation5 + $0x40] ss:$16 sps:$4 sm:$0xff]   ;;  %v3492_v7 = vld [vmem:[#allocation5 + $0x64] ss:$16 sps:$4 sm:$0xff]   ;;  %v3510_v12 = vld [vmem:[#allocation5 + $0x2c] ss:$16 sps:$4 sm:$0xff]   ;;  %339 = vmatpush1.bf16.msra.mxu1 %v3509_v11 }
  0x4f   :  { %299 = vmatprep.subr.bf16.mxu0 %v3486_v3  ;;  %v3494_v8 = vld [vmem:[#allocation5 + $0x60] ss:$16 sps:$4 sm:$0xff]   ;;  %v3495_v9 = vld [vmem:[#allocation5 + $0x84] ss:$16 sps:$4 sm:$0xff]   ;;  %v3512_v14 = vld [vmem:[#allocation5 + $0x28] ss:$16 sps:$4 sm:$0xff]   ;;  %340 = vmatprep.subr.bf16.mxu1 %v3510_v12 }
  0x50   :  { %v3497_v13 = vld [vmem:[#allocation5 + $0x80] ss:$16 sps:$4 sm:$0xff]   ;;  %v3513_v15 = vld [vmem:[#allocation5 + $0x4c] ss:$16 sps:$4 sm:$0xff]   ;;  %v3498_v16 = vld [vmem:[#allocation5 + $0xa4] ss:$16 sps:$4 sm:$0xff]  }
  0x51   :  { %v3500_v17 = vld [vmem:[#allocation5 + $0xa0] ss:$16 sps:$4 sm:$0xff]   ;;  %v3515_v18 = vld [vmem:[#allocation5 + $0x48] ss:$16 sps:$4 sm:$0xff]   ;;  %v3516_v19 = vld [vmem:[#allocation5 + $0x6c] ss:$16 sps:$4 sm:$0xff]  }
  0x52   :  { %300 = vmatpush1.bf16.msra.mxu0 %v3488_v4  ;;  %341 = vmatpush1.bf16.msra.mxu1 %v3512_v14  ;;  %v3501_v20 = vld [vmem:[#allocation5 + $0xc4] ss:$16 sps:$4 sm:$0xff]   ;;  %v3518_v21 = vld [vmem:[#allocation5 + $0x68] ss:$16 sps:$4 sm:$0xff]   ;;  %v3503_v22 = vld [vmem:[#allocation5 + $0xc0] ss:$16 sps:$4 sm:$0xff]  }
  0x53   :  { %301 = vmatprep.subr.bf16.mxu0 %v3489_v5  ;;  %342 = vmatprep.subr.bf16.mxu1 %v3513_v15  ;;  %v3519_v23 = vld [vmem:[#allocation5 + $0x8c] ss:$16 sps:$4 sm:$0xff]   ;;  %v3504_v24 = vld [vmem:[#allocation5 + $0xe4] ss:$16 sps:$4 sm:$0xff]   ;;  %v3521_v27 = vld [vmem:[#allocation5 + $0x88] ss:$16 sps:$4 sm:$0xff]  }
  0x54   :  { %v387_v25 = vld [vmem:[#allocation7] sm:$0xff]  ;;  %v3522_v30 = vld [vmem:[#allocation5 + $0xac] ss:$16 sps:$4 sm:$0xff]   ;;  %v3524_v35 = vld [vmem:[#allocation5 + $0xa8] ss:$16 sps:$4 sm:$0xff]  }
  0x55   :  { %v391_v26 = vld [vmem:[#allocation7 + $0x20] sm:$0xff]  ;;  %v3525_v36 = vld [vmem:[#allocation5 + $0xcc] ss:$16 sps:$4 sm:$0xff]   ;;  %v3527_v41 = vld [vmem:[#allocation5 + $0xc8] ss:$16 sps:$4 sm:$0xff]  }
  0x56   :  { %302 = vmatpush1.bf16.msra.mxu0 %v3491_v6  ;;  %343 = vmatpush1.bf16.msra.mxu1 %v3515_v18  ;;  %v3506_v28 = vld [vmem:[#allocation5 + $0xe0] ss:$16 sps:$4 sm:$0xff]   ;;  %v3039_v31 = vcombine.high %v387_v25, %v391_v26  ;;  %v3038_v37 = vcombine.low %v387_v25, %v391_v26  ;;  %v3528_v42 = vld [vmem:[#allocation5 + $0xec] ss:$16 sps:$4 sm:$0xff]   ;;  %v3530_v49 = vld [vmem:[#allocation5 + $0xe8] ss:$16 sps:$4 sm:$0xff]  }
  0x57   :  { %303 = vmatprep.subr.bf16.mxu0 %v3492_v7  ;;  %344 = vmatprep.subr.bf16.mxu1 %v3516_v19  ;;  %v395_v32 = vld [vmem:[#allocation7 + $0x40] sm:$0xff]  ;;  %v388_v44 = vld [vmem:[#allocation7 + $0x8] sm:$0xff] }
  0x58   :  { %v399_v33 = vld [vmem:[#allocation7 + $0x60] sm:$0xff]  ;;  %v392_v45 = vld [vmem:[#allocation7 + $0x28] sm:$0xff] }
  0x59   :  { %v3047_v38 = vcombine.high %v395_v32, %v399_v33  ;;  %v403_v39 = vld [vmem:[#allocation7 + $0x80] sm:$0xff]  ;;  %v3046_v43 = vcombine.low %v395_v32, %v399_v33  ;;  %v3041_v50 = vcombine.high %v388_v44, %v392_v45  ;;  %v396_v51 = vld [vmem:[#allocation7 + $0x48] sm:$0xff]  ;;  %v3040_v57 = vcombine.low %v388_v44, %v392_v45 }
  0x5a   :  { %304 = vmatpush1.bf16.msra.mxu0 %v3494_v8  ;;  %345 = vmatpush1.bf16.msra.mxu1 %v3518_v21  ;;  %v407_v40 = vld [vmem:[#allocation7 + $0xa0] sm:$0xff]  ;;  %v400_v52 = vld [vmem:[#allocation7 + $0x68] sm:$0xff] }
  0x5b   :  { %305 = vmatprep.subr.bf16.mxu0 %v3495_v9  ;;  %346 = vmatprep.subr.bf16.mxu1 %v3519_v23  ;;  %v3055_v46 = vcombine.high %v403_v39, %v407_v40  ;;  %v411_v47 = vld [vmem:[#allocation7 + $0xc0] sm:$0xff]  ;;  %v3054_v53 = vcombine.low %v403_v39, %v407_v40  ;;  %v404_v58 = vld [vmem:[#allocation7 + $0x88] sm:$0xff]  ;;  %v3049_v60 = vcombine.high %v396_v51, %v400_v52 }
  0x5c   :  { %v415_v48 = vld [vmem:[#allocation7 + $0xe0] sm:$0xff]  ;;  %v408_v59 = vld [vmem:[#allocation7 + $0xa8] sm:$0xff]  ;;  %v3048_v1 = vcombine.low %v396_v51, %v400_v52 }
  0x5d   :  { %v3063_v54 = vcombine.high %v411_v47, %v415_v48  ;;  %v419_v55 = vld [vmem:[#allocation7 + $0x100] sm:$0xff]  ;;  %v3062_v61 = vcombine.low %v411_v47, %v415_v48  ;;  %v412_v2 = vld [vmem:[#allocation7 + $0xc8] sm:$0xff]  ;;  %v3057_v4 = vcombine.high %v404_v58, %v408_v59  ;;  %v3056_v9 = vcombine.low %v404_v58, %v408_v59 }
  0x5e   :  { %306 = vmatpush1.bf16.msra.mxu0 %v3497_v13  ;;  %347 = vmatpush1.bf16.msra.mxu1 %v3521_v27  ;;  %v423_v56 = vld [vmem:[#allocation7 + $0x120] sm:$0xff]  ;;  %v416_v3 = vld [vmem:[#allocation7 + $0xe8] sm:$0xff] }
  0x5f   :  { %307 = vmatprep.subr.bf16.mxu0 %v3498_v16  ;;  %348 = vmatprep.subr.bf16.mxu1 %v3522_v30  ;;  %v427_v62 = vld [vmem:[#allocation7 + $0x140] sm:$0xff]  ;;  %v3071_v0 = vcombine.high %v419_v55, %v423_v56  ;;  %v3070_v5 = vcombine.low %v419_v55, %v423_v56  ;;  %v420_v10 = vld [vmem:[#allocation7 + $0x108] sm:$0xff]  ;;  %v3065_v12 = vcombine.high %v412_v2, %v416_v3 }
  0x60   :  { %v431_v63 = vld [vmem:[#allocation7 + $0x160] sm:$0xff]  ;;  %v424_v11 = vld [vmem:[#allocation7 + $0x128] sm:$0xff] }
  0x61   :  { %v435_v6 = vld [vmem:[#allocation7 + $0x180] sm:$0xff]  ;;  %v3079_v8 = vcombine.high %v427_v62, %v431_v63  ;;  %v3078_v13 = vcombine.low %v427_v62, %v431_v63  ;;  %v428_v18 = vld [vmem:[#allocation7 + $0x148] sm:$0xff]  ;;  %v3072_v25 = vcombine.low %v420_v10, %v424_v11 }
  0x62   :  { %308 = vmatpush1.bf16.msra.mxu0 %v3500_v17  ;;  %349 = vmatpush1.bf16.msra.mxu1 %v3524_v35  ;;  %v439_v7 = vld [vmem:[#allocation7 + $0x1a0] sm:$0xff]  ;;  %v3064_v17 = vcombine.low %v412_v2, %v416_v3  ;;  %v432_v19 = vld [vmem:[#allocation7 + $0x168] sm:$0xff] }
  0x63   :  { %309 = vmatprep.subr.bf16.mxu0 %v3501_v20  ;;  %350 = vmatprep.subr.bf16.mxu1 %v3525_v36  ;;  %v443_v14 = vld [vmem:[#allocation7 + $0x1c0] sm:$0xff]  ;;  %v3087_v16 = vcombine.high %v435_v6, %v439_v7  ;;  %v3073_v20 = vcombine.high %v420_v10, %v424_v11  ;;  %v3086_v21 = vcombine.low %v435_v6, %v439_v7  ;;  %v436_v26 = vld [vmem:[#allocation7 + $0x188] sm:$0xff] }
  0x64   :  { %v447_v15 = vld [vmem:[#allocation7 + $0x1e0] sm:$0xff]  ;;  %v440_v27 = vld [vmem:[#allocation7 + $0x1a8] sm:$0xff]  ;;  %v3080_v33 = vcombine.low %v428_v18, %v432_v19 }
  0x65   :  { %v455_v23 = vld [vmem:[#allocation7 + $0x220] sm:$0xff]  ;;  %v3094_v29 = vcombine.low %v443_v14, %v447_v15  ;;  %v448_v35 = vld [vmem:[#allocation7 + $0x1e8] sm:$0xff]  ;;  %v3089_v36 = vcombine.high %v436_v26, %v440_v27 }
  0x66   :  { %310 = vmatpush1.bf16.msra.mxu0 %v3503_v22  ;;  %351 = vmatpush1.bf16.msra.mxu1 %v3527_v41  ;;  %v451_v22 = vld [vmem:[#allocation7 + $0x200] sm:$0xff]  ;;  %v3088_v41 = vcombine.low %v436_v26, %v440_v27  ;;  %v464_v51 = vld [vmem:[#allocation7 + $0x268] sm:$0xff] }
  0x67   :  { %311 = vmatprep.subr.bf16.mxu0 %v3504_v24  ;;  %352 = vmatprep.subr.bf16.mxu1 %v3528_v42  ;;  %v3095_v24 = vcombine.high %v443_v14, %v447_v15  ;;  %v459_v30 = vld [vmem:[#allocation7 + $0x240] sm:$0xff]  ;;  %v3103_v32 = vcombine.high %v451_v22, %v455_v23  ;;  %v452_v42 = vld [vmem:[#allocation7 + $0x208] sm:$0xff] }
  0x68   :  { %v471_v39 = vld [vmem:[#allocation7 + $0x2a0] sm:$0xff]  ;;  %v468_v58 = vld [vmem:[#allocation7 + $0x288] sm:$0xff] }
  0x69   :  { %v479_v47 = vld [vmem:[#allocation7 + $0x2e0] sm:$0xff]  ;;  %v472_v59 = vld [vmem:[#allocation7 + $0x2a8] sm:$0xff] }
  0x6a   :  { %312 = vmatpush1.bf16.msra.mxu0 %v3506_v28  ;;  %353 = vmatpush1.bf16.msra.mxu1 %v3530_v49  ;;  %v3081_v28 = vcombine.high %v428_v18, %v432_v19  ;;  %v487_v55 = vld [vmem:[#allocation7 + $0x320] sm:$0xff]  ;;  %v476_v2 = vld [vmem:[#allocation7 + $0x2c8] sm:$0xff]  ;;  %v3120_v7 = vcombine.low %v468_v58, %v472_v59 }
  0x6b   :  { %1965 = vmatprep.subr.bf16.mxu0 %v3039_v31  ;;  %2047 = vmatprep.subr.bf16.mxu1 %v3041_v50  ;;  %v463_v31 = vld [vmem:[#allocation7 + $0x260] sm:$0xff]  ;;  %v460_v50 = vld [vmem:[#allocation7 + $0x248] sm:$0xff] }
  0x6c   :  { %v3111_v40 = vcombine.high %v459_v30, %v463_v31  ;;  %v3110_v45 = vcombine.low %v459_v30, %v463_v31  ;;  %v491_v62 = vld [vmem:[#allocation7 + $0x340] sm:$0xff]  ;;  %v480_v3 = vld [vmem:[#allocation7 + $0x2e8] sm:$0xff] }
  0x6d   :  { %330 = vmatmul.mubr.bf16.vlgmr.msra.gmra.mrb[0].mxu0 %v82_v34  ;;  %371 = vmatmul.mubr.bf16.vlgmr.msra.gmra.mrb[0].mxu1 %v82_v34  ;;  %v444_v34 = vld [vmem:[#allocation7 + $0x1c8] sm:$0xff]  ;;  %v495_v63 = vld [vmem:[#allocation7 + $0x360] sm:$0xff] }
  0x6e   :  { %1966 = vmatpush1.bf16.msra.mxu0 %v3038_v37  ;;  %2048 = vmatpush1.bf16.msra.mxu1 %v3040_v57  ;;  %v3102_v37 = vcombine.low %v451_v22, %v455_v23  ;;  %v3097_v44 = vcombine.high %v444_v34, %v448_v35  ;;  %v3096_v49 = vcombine.low %v444_v34, %v448_v35  ;;  %v484_v10 = vld [vmem:[#allocation7 + $0x308] sm:$0xff]  ;;  %v499_v19 = vld [vmem:[#allocation7 + $0x380] sm:$0xff] }
  0x6f   :  { %1967 = vmatprep.subr.bf16.mxu0 %v3047_v38  ;;  %2049 = vmatprep.subr.bf16.mxu1 %v3049_v60  ;;  %v467_v38 = vld [vmem:[#allocation7 + $0x280] sm:$0xff]  ;;  %v3113_v60 = vcombine.high %v460_v50, %v464_v51  ;;  %v3143_v6 = vcombine.high %v491_v62, %v495_v63  ;;  %v488_v11 = vld [vmem:[#allocation7 + $0x328] sm:$0xff] }
  0x70   :  { %v3119_v48 = vcombine.high %v467_v38, %v471_v39  ;;  %v492_v14 = vld [vmem:[#allocation7 + $0x348] sm:$0xff]  ;;  %v507_v27 = vld [vmem:[#allocation7 + $0x3c0] sm:$0xff] }
  0x71   :  { %v496_v15 = vld [vmem:[#allocation7 + $0x368] sm:$0xff]  ;;  %v515_v35 = vld [vmem:[#allocation7 + $0x400] sm:$0xff] }
  0x72   :  { %1968 = vmatpush1.bf16.msra.mxu0 %v3046_v43  ;;  %2050 = vmatpush1.bf16.msra.mxu1 %v3048_v1  ;;  %v456_v43 = vld [vmem:[#allocation7 + $0x228] sm:$0xff]  ;;  %v3112_v1 = vcombine.low %v460_v50, %v464_v51  ;;  %v3144_v18 = vcombine.low %v492_v14, %v496_v15 }
  0x73   :  { %1969 = vmatprep.subr.bf16.mxu0 %v3055_v46  ;;  %2051 = vmatprep.subr.bf16.mxu1 %v3057_v4  ;;  %v475_v46 = vld [vmem:[#allocation7 + $0x2c0] sm:$0xff]  ;;  %v3105_v52 = vcombine.high %v452_v42, %v456_v43  ;;  %v3104_v57 = vcombine.low %v452_v42, %v456_v43  ;;  %v3121_v4 = vcombine.high %v468_v58, %v472_v59  ;;  %v504_v23 = vld [vmem:[#allocation7 + $0x3a8] sm:$0xff]  ;;  %v117_v43 = vlaneseq }
  0x74   :  { %v3127_v56 = vcombine.high %v475_v46, %v479_v47  ;;  %v512_v31 = vld [vmem:[#allocation7 + $0x3e8] sm:$0xff]  ;;  %v527_v59 = vld [vmem:[#allocation7 + $0x460] sm:$0xff] }
  0x76   :  { %1970 = vmatpush1.bf16.msra.mxu0 %v3054_v53  ;;  %2052 = vmatpush1.bf16.msra.mxu1 %v3056_v9  ;;  %v3118_v53 = vcombine.low %v467_v38, %v471_v39  ;;  %v3142_v9 = vcombine.low %v491_v62, %v495_v63  ;;  %v520_v39 = vld [vmem:[#allocation7 + $0x428] sm:$0xff] }
  0x77   :  { %1971 = vmatprep.subr.bf16.mxu0 %v3063_v54  ;;  %2053 = vmatprep.subr.bf16.mxu1 %v3065_v12  ;;  %v483_v54 = vld [vmem:[#allocation7 + $0x300] sm:$0xff]  ;;  %v3128_v12 = vcombine.low %v476_v2, %v480_v3 }
  0x7a   :  { %1972 = vmatpush1.bf16.msra.mxu0 %v3062_v61  ;;  %2054 = vmatpush1.bf16.msra.mxu1 %v3064_v17  ;;  %v3126_v61 = vcombine.low %v475_v46, %v479_v47  ;;  %v3145_v17 = vcombine.high %v492_v14, %v496_v15  ;;  %v3819_v46 = vld [vmem:[%s3905_s2] sm:$0xf]  ;;  %v543_v14 = vld [vmem:[#allocation7 + $0x4e0] sm:$0xff]  ;;  %v540_v15 = vld [vmem:[#allocation7 + $0x4c8] sm:$0xff] }
  0x7b   :  { %1973 = vmatprep.subr.bf16.mxu0 %v3071_v0  ;;  %2055 = vmatprep.subr.bf16.mxu1 %v3073_v20  ;;  %v3135_v0 = vcombine.high %v483_v54, %v487_v55  ;;  %v503_v20 = vld [vmem:[#allocation7 + $0x3a0] sm:$0xff] }
  0x7c   :  { %v3151_v22 = vcombine.high %v499_v19, %v503_v20 }
  0x7e   :  { %1974 = vmatpush1.bf16.msra.mxu0 %v3070_v5  ;;  %2056 = vmatpush1.bf16.msra.mxu1 %v3072_v25  ;;  %v3134_v5 = vcombine.low %v483_v54, %v487_v55 }
  0x7f   :  { %1975 = vmatprep.subr.bf16.mxu0 %v3079_v8  ;;  %2057 = vmatprep.subr.bf16.mxu1 %v3081_v28  ;;  %v3129_v8 = vcombine.high %v476_v2, %v480_v3  ;;  %v511_v28 = vld [vmem:[#allocation7 + $0x3e0] sm:$0xff] }
  0x80   :  { %v3159_v30 = vcombine.high %v507_v27, %v511_v28  ;;  %v531_v3 = vld [vmem:[#allocation7 + $0x480] sm:$0xff] }
  0x82   :  { %1976 = vmatpush1.bf16.msra.mxu0 %v3078_v13  ;;  %2058 = vmatpush1.bf16.msra.mxu1 %v3080_v33  ;;  %v3137_v13 = vcombine.high %v484_v10, %v488_v11 }
  0x83   :  { %1977 = vmatprep.subr.bf16.mxu0 %v3087_v16  ;;  %2059 = vmatprep.subr.bf16.mxu1 %v3089_v36  ;;  %v3136_v16 = vcombine.low %v484_v10, %v488_v11  ;;  %v519_v36 = vld [vmem:[#allocation7 + $0x420] sm:$0xff] }
  0x84   :  { %v3167_v38 = vcombine.high %v515_v35, %v519_v36 }
  0x86   :  { %1978 = vmatpush1.bf16.msra.mxu0 %v3086_v21  ;;  %2060 = vmatpush1.bf16.msra.mxu1 %v3088_v41  ;;  %v500_v21 = vld [vmem:[#allocation7 + $0x388] sm:$0xff] }
  0x87   :  { %1979 = vmatprep.subr.bf16.mxu0 %v3095_v24  ;;  %2061 = vmatprep.subr.bf16.mxu1 %v3097_v44  ;;  %v3150_v24 = vcombine.low %v499_v19, %v503_v20  ;;  %v3152_v25 = vcombine.low %v500_v21, %v504_v23  ;;  %v3153_v26 = vcombine.high %v500_v21, %v504_v23  ;;  %v3813_v44 = vshrl.u32 %v117_v43, 7  ;;  %v563_v43 = vld [vmem:[#allocation7 + $0x580] sm:$0xff] }
  0x89   :  { %v123_v47 = vsub.s32 1, %v3813_v44  ;;  %v131_v62 = vsub.s32 3, %v3813_v44 }
  0x8a   :  { %1980 = vmatpush1.bf16.msra.mxu0 %v3094_v29  ;;  %2062 = vmatpush1.bf16.msra.mxu1 %v3096_v49  ;;  %v508_v29 = vld [vmem:[#allocation7 + $0x3c8] sm:$0xff] }
  0x8b   :  { %1981 = vmatprep.subr.bf16.mxu0 %v3103_v32  ;;  %2063 = vmatprep.subr.bf16.mxu1 %v3105_v52  ;;  %v3158_v32 = vcombine.low %v507_v27, %v511_v28  ;;  %v3160_v33 = vcombine.low %v508_v29, %v512_v31  ;;  %v3161_v34 = vcombine.high %v508_v29, %v512_v31  ;;  %v551_v27 = vld [vmem:[#allocation7 + $0x520] sm:$0xff]  ;;  %v548_v28 = vld [vmem:[#allocation7 + $0x508] sm:$0xff] }
  0x8c   :  { %v124_v49 = vrot.slane %v3819_v46, %v123_v47  ;;  %v552_v29 = vld [vmem:[#allocation7 + $0x528] sm:$0xff] }
  0x8e   :  { %1982 = vmatpush1.bf16.msra.mxu0 %v3102_v37  ;;  %2064 = vmatpush1.bf16.msra.mxu1 %v3104_v57  ;;  %v516_v37 = vld [vmem:[#allocation7 + $0x408] sm:$0xff]  ;;  %v523_v57 = vld [vmem:[#allocation7 + $0x440] sm:$0xff] }
  0x8f   :  { %1983 = vmatprep.subr.bf16.mxu0 %v3111_v40  ;;  %2065 = vmatprep.subr.bf16.mxu1 %v3113_v60  ;;  %v3166_v40 = vcombine.low %v515_v35, %v519_v36  ;;  %v3168_v41 = vcombine.low %v516_v37, %v520_v39  ;;  %v3169_v42 = vcombine.high %v516_v37, %v520_v39  ;;  %v524_v60 = vld [vmem:[#allocation7 + $0x448] sm:$0xff]  ;;  %v555_v35 = vld [vmem:[#allocation7 + $0x540] sm:$0xff] }
  0x90   :  { %v559_v36 = vld [vmem:[#allocation7 + $0x560] sm:$0xff]  ;;  %v556_v37 = vld [vmem:[#allocation7 + $0x548] sm:$0xff] }
  0x92   :  { %1984 = vmatpush1.bf16.msra.mxu0 %v3110_v45  ;;  %2066 = vmatpush1.bf16.msra.mxu1 %v3112_v1  ;;  %v119_v45 = vsub.s32 0, %v3813_v44  ;;  %v3175_v1 = vcombine.high %v523_v57, %v527_v59 }
  0x93   :  { %1985 = vmatprep.subr.bf16.mxu0 %v3119_v48  ;;  %2067 = vmatprep.subr.bf16.mxu1 %v3121_v4  ;;  %v535_v4 = vld [vmem:[#allocation7 + $0x4a0] sm:$0xff] }
  0x94   :  { %v120_v48 = vrot.slane %v3819_v46, %v119_v45  ;;  %v3183_v10 = vcombine.high %v531_v3, %v535_v4  ;;  %v3182_v20 = vcombine.low %v531_v3, %v535_v4  ;;  %v583_v3 = vld [vmem:[#allocation7 + $0x620] sm:$0xff]  ;;  %v580_v4 = vld [vmem:[#allocation7 + $0x608] sm:$0xff] }
  0x96   :  { %1986 = vmatpush1.bf16.msra.mxu0 %v3118_v53  ;;  %2068 = vmatpush1.bf16.msra.mxu1 %v3120_v7  ;;  %v132_v7 = vrot.slane %v3819_v46, %v131_v62 }
  0x97   :  { %1987 = vmatprep.subr.bf16.mxu0 %v3127_v56  ;;  %2069 = vmatprep.subr.bf16.mxu1 %v3129_v8  ;;  %v3174_v8 = vcombine.low %v523_v57, %v527_v59  ;;  %v572_v57 = vld [vmem:[#allocation7 + $0x5c8] sm:$0xff] }
  0x9a   :  { %1988 = vmatpush1.bf16.msra.mxu0 %v3126_v61  ;;  %2070 = vmatpush1.bf16.msra.mxu1 %v3128_v12  ;;  %v528_v61 = vld [vmem:[#allocation7 + $0x468] sm:$0xff]  ;;  %v539_v12 = vld [vmem:[#allocation7 + $0x4c0] sm:$0xff] }
  0x9b   :  { %1989 = vmatprep.subr.bf16.mxu0 %v3135_v0  ;;  %2071 = vmatprep.subr.bf16.mxu1 %v3137_v13  ;;  %v3177_v2 = vcombine.high %v524_v60, %v528_v61  ;;  %v3191_v23 = vcombine.high %v539_v12, %v543_v14  ;;  %v3190_v31 = vcombine.low %v539_v12, %v543_v14  ;;  %v588_v12 = vld [vmem:[#allocation7 + $0x648] sm:$0xff] }
  0x9c   :  { %v592_v14 = vld [vmem:[#allocation7 + $0x668] sm:$0xff] }
  0x9e   :  { %1990 = vmatpush1.bf16.msra.mxu0 %v3134_v5  ;;  %2072 = vmatpush1.bf16.msra.mxu1 %v3136_v16  ;;  %v532_v5 = vld [vmem:[#allocation7 + $0x488] sm:$0xff] }
  0x9f   :  { %1991 = vmatprep.subr.bf16.mxu0 %v3143_v6  ;;  %2073 = vmatprep.subr.bf16.mxu1 %v3145_v17  ;;  %v536_v6 = vld [vmem:[#allocation7 + $0x4a8] sm:$0xff] }
  0xa0   :  { %v3185_v11 = vcombine.high %v532_v5, %v536_v6  ;;  %v544_v16 = vld [vmem:[#allocation7 + $0x4e8] sm:$0xff]  ;;  %v3184_v21 = vcombine.low %v532_v5, %v536_v6 }
  0xa1   :  { %v584_v5 = vld [vmem:[#allocation7 + $0x628] sm:$0xff] }
  0xa2   :  { %1992 = vmatpush1.bf16.msra.mxu0 %v3142_v9  ;;  %2074 = vmatpush1.bf16.msra.mxu1 %v3144_v18  ;;  %v3176_v9 = vcombine.low %v524_v60, %v528_v61 }
  0xa3   :  { %1993 = vmatprep.subr.bf16.mxu0 %v3151_v22  ;;  %2075 = vmatprep.subr.bf16.mxu1 %v3153_v26 }
  0xa6   :  { %1994 = vmatpush1.bf16.msra.mxu0 %v3150_v24  ;;  %2076 = vmatpush1.bf16.msra.mxu1 %v3152_v25  ;;  %v3193_v24 = vcombine.high %v540_v15, %v544_v16  ;;  %v547_v25 = vld [vmem:[#allocation7 + $0x500] sm:$0xff] }
  0xa7   :  { %1995 = vmatprep.subr.bf16.mxu0 %v3159_v30  ;;  %2077 = vmatprep.subr.bf16.mxu1 %v3161_v34  ;;  %v3201_v34 = vcombine.high %v548_v28, %v552_v29  ;;  %v3198_v39 = vcombine.low %v547_v25, %v551_v27 }
  0xaa   :  { %1996 = vmatpush1.bf16.msra.mxu0 %v3158_v32  ;;  %2078 = vmatpush1.bf16.msra.mxu1 %v3160_v33  ;;  %v3192_v32 = vcombine.low %v540_v15, %v544_v16  ;;  %v3199_v33 = vcombine.high %v547_v25, %v551_v27  ;;  %v3232_v16 = vcombine.low %v580_v4, %v584_v5  ;;  %v603_v27 = vld [vmem:[#allocation7 + $0x6c0] sm:$0xff] }
  0xab   :  { %2006 = vmatprep.subr.bf16.mxu0 %v3167_v38  ;;  %2088 = vmatprep.subr.bf16.mxu1 %v3169_v42  ;;  %v560_v38 = vld [vmem:[#allocation7 + $0x568] sm:$0xff] }
  0xac   :  { %v3209_v42 = vcombine.high %v556_v37, %v560_v38 }
 0x140   :  { %v331_v50 = vpop.f32.mrb[0].mxu0  ;;  %v3840_v13 = vpop.f32.mrb[0].mxu1 }
 0x141   :  { %v332_v51 = vadd.f32 %v331_v50, %v120_v48  ;;  %v333_v52 = vpop.f32.mrb[1].mxu0  ;;  %v374_v17 = vpop.f32.mrb[1].mxu1  ;;  %v567_v48 = vld [vmem:[#allocation7 + $0x5a0] sm:$0xff]  ;;  %v568_v50 = vld [vmem:[#allocation7 + $0x5a8] sm:$0xff] }
 0x142   :  { %v334_v53 = vadd.f32 %v333_v52, %v124_v49  ;;  %v335_v54 = vpop.f32.mrb[2].mxu0  ;;  %v375_v18 = vadd.f32 %v374_v17, %v132_v7  ;;  %v376_v19 = vpop.f32.mrb[2].mxu1  ;;  %v564_v49 = vld [vmem:[#allocation7 + $0x588] sm:$0xff]  ;;  %v3208_v52 = vcombine.low %v556_v37, %v560_v38  ;;  %v3214_v59 = vcombine.low %v563_v43, %v567_v48  ;;  %v615_v37 = vld [vmem:[#allocation7 + $0x720] sm:$0xff] }
 0x143   :  { %v379_v55 = vmax.f32 %v332_v51, 0.0  ;;  %v336_v56 = vpop.f32.mrb[3].mxu0  ;;  %v377_v22 = vpop.f32.mrb[3].mxu1  ;;  %v3206_v51 = vcombine.low %v555_v35, %v559_v36  ;;  %v3217_v54 = vcombine.high %v564_v49, %v568_v50  ;;  %v3216_v60 = vcombine.low %v564_v49, %v568_v50  ;;  %v595_v19 = vld [vmem:[#allocation7 + $0x680] sm:$0xff]  ;;  %v612_v38 = vld [vmem:[#allocation7 + $0x708] sm:$0xff] }
 0x144   :  { %v380_v58 = vmax.f32 %v334_v53, 0.0  ;;  %v382_v26 = vmax.f32 %v375_v18, 0.0  ;;  %v3215_v53 = vcombine.high %v563_v43, %v567_v48  ;;  %v575_v56 = vld [vmem:[#allocation7 + $0x5e0] sm:$0xff]  ;;  %v3241_v18 = vcombine.high %v588_v12, %v592_v14  ;;  %v600_v22 = vld [vmem:[#allocation7 + $0x6a8] sm:$0xff] }
 0x145   :  { %v3831_v0 = vpack.c.bf16 %v379_v55, %v379_v55  ;;  %v571_v55 = vld [vmem:[#allocation7 + $0x5c0] sm:$0xff]  ;;  %v620_v50 = vld [vmem:[#allocation7 + $0x748] sm:$0xff] }
 0x146   :  { %v3829_v63 = vpack.c.bf16 %v380_v58, %v380_v58  ;;  %v3842_v30 = vpack.c.bf16 %v382_v26, %v382_v26  ;;  %v576_v58 = vld [vmem:[#allocation7 + $0x5e8] sm:$0xff]  ;;  %v3223_v61 = vcombine.high %v571_v55, %v575_v56  ;;  %v3222_v6 = vcombine.low %v571_v55, %v575_v56  ;;  %v619_v48 = vld [vmem:[#allocation7 + $0x740] sm:$0xff] }
 0x147   :  { %v3224_v7 = vcombine.low %v572_v57, %v576_v58  ;;  %v623_v49 = vld [vmem:[#allocation7 + $0x760] sm:$0xff] }
 0x148   :  { %1997 = vmatprep.mubr.bf16.mxu0 %v3829_v63  ;;  %2079 = vmatprep.mubr.bf16.mxu1 %v3829_v63  ;;  %v3271_v55 = vcombine.high %v619_v48, %v623_v49 }
 0x149   :  { %1998 = vmatmul.mubr.bf16.vlgmr.msra.gmra.mrb[4].mxu0 %v3831_v0  ;;  %2080 = vmatmul.mubr.bf16.vlgmr.msra.gmra.mrb[4].mxu1 %v3831_v0 }
 0x14a   :  { %2007 = vmatpush1.bf16.msra.mxu0 %v3166_v40  ;;  %2089 = vmatpush1.bf16.msra.mxu1 %v3168_v41  ;;  %v3200_v40 = vcombine.low %v548_v28, %v552_v29  ;;  %v3207_v41 = vcombine.high %v555_v35, %v559_v36  ;;  %v607_v28 = vld [vmem:[#allocation7 + $0x6e0] sm:$0xff]  ;;  %v604_v29 = vld [vmem:[#allocation7 + $0x6c8] sm:$0xff] }
 0x14b   :  { %2008 = vmatprep.subr.bf16.mxu0 %v3175_v1  ;;  %2090 = vmatprep.subr.bf16.mxu1 %v3177_v2  ;;  %v3225_v1 = vcombine.high %v572_v57, %v576_v58  ;;  %v579_v2 = vld [vmem:[#allocation7 + $0x600] sm:$0xff] }
 0x14c   :  { %2038 = vmatprep.mubr.bf16.mxu0 %v3842_v30  ;;  %2120 = vmatprep.mubr.bf16.mxu1 %v3842_v30  ;;  %v3230_v15 = vcombine.low %v579_v2, %v583_v3  ;;  %v611_v36 = vld [vmem:[#allocation7 + $0x700] sm:$0xff] }
 0x14d   :  { %v627_v57 = vld [vmem:[#allocation7 + $0x780] sm:$0xff] }
 0x14e   :  { %2009 = vmatpush1.bf16.msra.mxu0 %v3174_v8  ;;  %2091 = vmatpush1.bf16.msra.mxu1 %v3176_v9  ;;  %v3231_v8 = vcombine.high %v579_v2, %v583_v3  ;;  %v3233_v9 = vcombine.high %v580_v4, %v584_v5  ;;  %v631_v58 = vld [vmem:[#allocation7 + $0x7a0] sm:$0xff] }
 0x14f   :  { %2010 = vmatprep.subr.bf16.mxu0 %v3183_v10  ;;  %2092 = vmatprep.subr.bf16.mxu1 %v3185_v11  ;;  %v587_v10 = vld [vmem:[#allocation7 + $0x640] sm:$0xff]  ;;  %v3279_v3 = vcombine.high %v627_v57, %v631_v58 }
 0x150   :  { %v591_v11 = vld [vmem:[#allocation7 + $0x660] sm:$0xff] }
 0x151   :  { %v3239_v17 = vcombine.high %v587_v10, %v591_v11  ;;  %v635_v5 = vld [vmem:[#allocation7 + $0x7c0] sm:$0xff] }
 0x152   :  { %2011 = vmatpush1.bf16.msra.mxu0 %v3182_v20  ;;  %2093 = vmatpush1.bf16.msra.mxu1 %v3184_v21  ;;  %v599_v20 = vld [vmem:[#allocation7 + $0x6a0] sm:$0xff]  ;;  %v596_v21 = vld [vmem:[#allocation7 + $0x688] sm:$0xff] }
 0x153   :  { %2012 = vmatprep.subr.bf16.mxu0 %v3191_v23  ;;  %2094 = vmatprep.subr.bf16.mxu1 %v3193_v24  ;;  %v3238_v23 = vcombine.low %v587_v10, %v591_v11  ;;  %v3240_v24 = vcombine.low %v588_v12, %v592_v14  ;;  %v3247_v25 = vcombine.high %v595_v19, %v599_v20  ;;  %v389_v14 = vld [vmem:[#allocation7 + $0x10] sm:$0xff] }
 0x154   :  { %v3249_v26 = vcombine.high %v596_v21, %v600_v22  ;;  %v3278_v10 = vcombine.low %v627_v57, %v631_v58 }
 0x156   :  { %2013 = vmatpush1.bf16.msra.mxu0 %v3190_v31  ;;  %2095 = vmatpush1.bf16.msra.mxu1 %v3192_v32  ;;  %v608_v31 = vld [vmem:[#allocation7 + $0x6e8] sm:$0xff]  ;;  %v3246_v32 = vcombine.low %v595_v19, %v599_v20 }
 0x157   :  { %2014 = vmatprep.subr.bf16.mxu0 %v3199_v33  ;;  %2096 = vmatprep.subr.bf16.mxu1 %v3201_v34  ;;  %v3248_v33 = vcombine.low %v596_v21, %v600_v22  ;;  %v3255_v34 = vcombine.high %v603_v27, %v607_v28  ;;  %v3257_v35 = vcombine.high %v604_v29, %v608_v31  ;;  %v397_v22 = vld [vmem:[#allocation7 + $0x50] sm:$0xff] }
 0x15a   :  { %2015 = vmatpush1.bf16.msra.mxu0 %v3198_v39  ;;  %2097 = vmatpush1.bf16.msra.mxu1 %v3200_v40  ;;  %v616_v39 = vld [vmem:[#allocation7 + $0x728] sm:$0xff]  ;;  %v3254_v40 = vcombine.low %v603_v27, %v607_v28 }
 0x15b   :  { %2016 = vmatprep.subr.bf16.mxu0 %v3207_v41  ;;  %2098 = vmatprep.subr.bf16.mxu1 %v3209_v42  ;;  %v3256_v41 = vcombine.low %v604_v29, %v608_v31  ;;  %v3263_v42 = vcombine.high %v611_v36, %v615_v37  ;;  %v3265_v43 = vcombine.high %v612_v38, %v616_v39 }
 0x15e   :  { %2017 = vmatpush1.bf16.msra.mxu0 %v3206_v51  ;;  %2099 = vmatpush1.bf16.msra.mxu1 %v3208_v52  ;;  %v624_v51 = vld [vmem:[#allocation7 + $0x768] sm:$0xff]  ;;  %v127_v52 = vsub.s32 2, %v3813_v44 }
 0x15f   :  { %2018 = vmatprep.subr.bf16.mxu0 %v3215_v53  ;;  %2100 = vmatprep.subr.bf16.mxu1 %v3217_v54  ;;  %v3262_v53 = vcombine.low %v611_v36, %v615_v37  ;;  %v3264_v54 = vcombine.low %v612_v38, %v616_v39  ;;  %v3273_v56 = vcombine.high %v620_v50, %v624_v51 }
 0x160   :  { %v3272_v2 = vcombine.low %v620_v50, %v624_v51 }
 0x162   :  { %2019 = vmatpush1.bf16.msra.mxu0 %v3214_v59  ;;  %2101 = vmatpush1.bf16.msra.mxu1 %v3216_v60  ;;  %v628_v59 = vld [vmem:[#allocation7 + $0x788] sm:$0xff] }
 0x163   :  { %2020 = vmatprep.subr.bf16.mxu0 %v3223_v61  ;;  %2102 = vmatprep.subr.bf16.mxu1 %v3225_v1  ;;  %v632_v60 = vld [vmem:[#allocation7 + $0x7a8] sm:$0xff]  ;;  %v128_v61 = vrot.slane %v3819_v46, %v127_v52  ;;  %v3270_v1 = vcombine.low %v619_v48, %v623_v49 }
 0x164   :  { %v3281_v4 = vcombine.high %v628_v59, %v632_v60  ;;  %v3280_v11 = vcombine.low %v628_v59, %v632_v60  ;;  %v429_v60 = vld [vmem:[#allocation7 + $0x150] sm:$0xff] }
 0x166   :  { %2021 = vmatpush1.bf16.msra.mxu0 %v3222_v6  ;;  %2103 = vmatpush1.bf16.msra.mxu1 %v3224_v7  ;;  %v639_v6 = vld [vmem:[#allocation7 + $0x7e0] sm:$0xff]  ;;  %v636_v7 = vld [vmem:[#allocation7 + $0x7c8] sm:$0xff] }
 0x167   :  { %2022 = vmatprep.subr.bf16.mxu0 %v3231_v8  ;;  %2104 = vmatprep.subr.bf16.mxu1 %v3233_v9  ;;  %v640_v8 = vld [vmem:[#allocation7 + $0x7e8] sm:$0xff]  ;;  %v373_v9 = vadd.f32 %v3840_v13, %v128_v61  ;;  %v3287_v46 = vcombine.high %v635_v5, %v639_v6  ;;  %v3286_v19 = vcombine.low %v635_v5, %v639_v6  ;;  %v433_v61 = vld [vmem:[#allocation7 + $0x170] sm:$0xff] }
 0x168   :  { %v3289_v12 = vcombine.high %v636_v7, %v640_v8  ;;  %v3288_v20 = vcombine.low %v636_v7, %v640_v8  ;;  %v3083_v5 = vcombine.high %v429_v60, %v433_v61  ;;  %v437_v7 = vld [vmem:[#allocation7 + $0x190] sm:$0xff] }
 0x169   :  { %v441_v8 = vld [vmem:[#allocation7 + $0x1b0] sm:$0xff] }
 0x16a   :  { %2023 = vmatpush1.bf16.msra.mxu0 %v3230_v15  ;;  %2105 = vmatpush1.bf16.msra.mxu1 %v3232_v16  ;;  %v393_v15 = vld [vmem:[#allocation7 + $0x30] sm:$0xff]  ;;  %v390_v16 = vld [vmem:[#allocation7 + $0x18] sm:$0xff] }
 0x16b   :  { %2024 = vmatprep.subr.bf16.mxu0 %v3239_v17  ;;  %2106 = vmatprep.subr.bf16.mxu1 %v3241_v18  ;;  %v394_v17 = vld [vmem:[#allocation7 + $0x38] sm:$0xff]  ;;  %v381_v18 = vmax.f32 %v373_v9, 0.0  ;;  %v3043_v13 = vcombine.high %v389_v14, %v393_v15  ;;  %v3042_v27 = vcombine.low %v389_v14, %v393_v15  ;;  %v445_v15 = vld [vmem:[#allocation7 + $0x1d0] sm:$0xff] }
 0x16c   :  { %v3045_v21 = vcombine.high %v390_v16, %v394_v17  ;;  %v3044_v28 = vcombine.low %v390_v16, %v394_v17  ;;  %v438_v9 = vld [vmem:[#allocation7 + $0x198] sm:$0xff]  ;;  %v449_v16 = vld [vmem:[#allocation7 + $0x1f0] sm:$0xff] }
 0x16d   :  { %v446_v17 = vld [vmem:[#allocation7 + $0x1d8] sm:$0xff] }
 0x16e   :  { %2025 = vmatpush1.bf16.msra.mxu0 %v3238_v23  ;;  %2107 = vmatpush1.bf16.msra.mxu1 %v3240_v24  ;;  %v3851_v23 = vpack.c.bf16 %v381_v18, %v381_v18  ;;  %v401_v24 = vld [vmem:[#allocation7 + $0x70] sm:$0xff]  ;;  %v450_v18 = vld [vmem:[#allocation7 + $0x1f8] sm:$0xff] }
 0x16f   :  { %2026 = vmatprep.subr.bf16.mxu0 %v3247_v25  ;;  %2108 = vmatprep.subr.bf16.mxu1 %v3249_v26  ;;  %v398_v25 = vld [vmem:[#allocation7 + $0x58] sm:$0xff]  ;;  %v3051_v29 = vcombine.high %v397_v22, %v401_v24  ;;  %v3050_v36 = vcombine.low %v397_v22, %v401_v24  ;;  %v453_v22 = vld [vmem:[#allocation7 + $0x210] sm:$0xff] }
 0x170   :  { %v402_v26 = vld [vmem:[#allocation7 + $0x78] sm:$0xff]  ;;  %v457_v24 = vld [vmem:[#allocation7 + $0x230] sm:$0xff] }
 0x171   :  { %v3053_v31 = vcombine.high %v398_v25, %v402_v26  ;;  %v3052_v37 = vcombine.low %v398_v25, %v402_v26  ;;  %v454_v25 = vld [vmem:[#allocation7 + $0x218] sm:$0xff] }
 0x172   :  { %2027 = vmatpush1.bf16.msra.mxu0 %v3246_v32  ;;  %2109 = vmatpush1.bf16.msra.mxu1 %v3248_v33  ;;  %v405_v32 = vld [vmem:[#allocation7 + $0x90] sm:$0xff]  ;;  %v458_v26 = vld [vmem:[#allocation7 + $0x238] sm:$0xff] }
 0x173   :  { %2028 = vmatprep.subr.bf16.mxu0 %v3255_v34  ;;  %2110 = vmatprep.subr.bf16.mxu1 %v3257_v35  ;;  %v409_v33 = vld [vmem:[#allocation7 + $0xb0] sm:$0xff]  ;;  %v406_v34 = vld [vmem:[#allocation7 + $0x98] sm:$0xff] }
 0x174   :  { %v410_v35 = vld [vmem:[#allocation7 + $0xb8] sm:$0xff]  ;;  %v3059_v38 = vcombine.high %v405_v32, %v409_v33  ;;  %v3058_v48 = vcombine.low %v405_v32, %v409_v33  ;;  %v461_v32 = vld [vmem:[#allocation7 + $0x250] sm:$0xff] }
 0x175   :  { %v3061_v39 = vcombine.high %v406_v34, %v410_v35  ;;  %v3060_v49 = vcombine.low %v406_v34, %v410_v35  ;;  %v465_v33 = vld [vmem:[#allocation7 + $0x270] sm:$0xff]  ;;  %v462_v34 = vld [vmem:[#allocation7 + $0x258] sm:$0xff] }
 0x176   :  { %2029 = vmatpush1.bf16.msra.mxu0 %v3254_v40  ;;  %2111 = vmatpush1.bf16.msra.mxu1 %v3256_v41  ;;  %v413_v40 = vld [vmem:[#allocation7 + $0xd0] sm:$0xff]  ;;  %v466_v35 = vld [vmem:[#allocation7 + $0x278] sm:$0xff] }
 0x177   :  { %2030 = vmatprep.subr.bf16.mxu0 %v3263_v42  ;;  %2112 = vmatprep.subr.bf16.mxu1 %v3265_v43  ;;  %v417_v41 = vld [vmem:[#allocation7 + $0xf0] sm:$0xff]  ;;  %v414_v42 = vld [vmem:[#allocation7 + $0xd8] sm:$0xff] }
 0x178   :  { %v418_v43 = vld [vmem:[#allocation7 + $0xf8] sm:$0xff]  ;;  %v3067_v50 = vcombine.high %v413_v40, %v417_v41 }
 0x179   :  { %v3069_v51 = vcombine.high %v414_v42, %v418_v43  ;;  %v3068_v57 = vcombine.low %v414_v42, %v418_v43  ;;  %v470_v42 = vld [vmem:[#allocation7 + $0x298] sm:$0xff] }
 0x17a   :  { %2031 = vmatpush1.bf16.msra.mxu0 %v3262_v53  ;;  %2113 = vmatpush1.bf16.msra.mxu1 %v3264_v54  ;;  %v421_v53 = vld [vmem:[#allocation7 + $0x110] sm:$0xff]  ;;  %v474_v43 = vld [vmem:[#allocation7 + $0x2b8] sm:$0xff] }
 0x17b   :  { %2032 = vmatprep.subr.bf16.mxu0 %v3271_v55  ;;  %2114 = vmatprep.subr.bf16.mxu1 %v3273_v56  ;;  %v425_v54 = vld [vmem:[#allocation7 + $0x130] sm:$0xff]  ;;  %v426_v55 = vld [vmem:[#allocation7 + $0x138] sm:$0xff]  ;;  %v3066_v56 = vcombine.low %v413_v40, %v417_v41 }
 0x17c   :  { %v3075_v58 = vcombine.high %v421_v53, %v425_v54  ;;  %v469_v40 = vld [vmem:[#allocation7 + $0x290] sm:$0xff] }
 0x17d   :  { %v473_v41 = vld [vmem:[#allocation7 + $0x2b0] sm:$0xff] }
 0x17e   :  { %2033 = vmatpush1.bf16.msra.mxu0 %v3270_v1  ;;  %2115 = vmatpush1.bf16.msra.mxu1 %v3272_v2  ;;  %v430_v1 = vld [vmem:[#allocation7 + $0x158] sm:$0xff] }
 0x17f   :  { %2034 = vmatprep.subr.bf16.mxu0 %v3279_v3  ;;  %2116 = vmatprep.subr.bf16.mxu1 %v3281_v4  ;;  %v434_v2 = vld [vmem:[#allocation7 + $0x178] sm:$0xff]  ;;  %v3074_v3 = vcombine.low %v421_v53, %v425_v54  ;;  %v477_v53 = vld [vmem:[#allocation7 + $0x2d0] sm:$0xff] }
 0x180   :  { %v3085_v6 = vcombine.high %v430_v1, %v434_v2  ;;  %v481_v54 = vld [vmem:[#allocation7 + $0x2f0] sm:$0xff] }
 0x182   :  { %2035 = vmatpush1.bf16.msra.mxu0 %v3278_v10  ;;  %2117 = vmatpush1.bf16.msra.mxu1 %v3280_v11  ;;  %v442_v10 = vld [vmem:[#allocation7 + $0x1b8] sm:$0xff]  ;;  %v3082_v11 = vcombine.low %v429_v60, %v433_v61  ;;  %v485_v60 = vld [vmem:[#allocation7 + $0x310] sm:$0xff] }
 0x183   :  { %2036 = vmatprep.subr.bf16.mxu0 %v3287_v46  ;;  %2118 = vmatprep.subr.bf16.mxu1 %v3289_v12  ;;  %v3084_v46 = vcombine.low %v430_v1, %v434_v2  ;;  %v3091_v12 = vcombine.high %v437_v7, %v441_v8  ;;  %v3093_v14 = vcombine.high %v438_v9, %v442_v10  ;;  %v489_v61 = vld [vmem:[#allocation7 + $0x330] sm:$0xff]  ;;  %v486_v1 = vld [vmem:[#allocation7 + $0x318] sm:$0xff] }
 0x184   :  { %v490_v2 = vld [vmem:[#allocation7 + $0x338] sm:$0xff] }
 0x186   :  { %2037 = vmatpush1.bf16.msra.mxu0 %v3286_v19  ;;  %2119 = vmatpush1.bf16.msra.mxu1 %v3288_v20  ;;  %v3090_v19 = vcombine.low %v437_v7, %v441_v8  ;;  %v3092_v20 = vcombine.low %v438_v9, %v442_v10  ;;  %v493_v7 = vld [vmem:[#allocation7 + $0x350] sm:$0xff]  ;;  %v494_v9 = vld [vmem:[#allocation7 + $0x358] sm:$0xff] }
 0x187   :  { %2129 = vmatprep.subr.bf16.mxu0 %v3043_v13  ;;  %2211 = vmatprep.subr.bf16.mxu1 %v3045_v21  ;;  %v3099_v13 = vcombine.high %v445_v15, %v449_v16  ;;  %v3101_v21 = vcombine.high %v446_v17, %v450_v18  ;;  %v497_v8 = vld [vmem:[#allocation7 + $0x370] sm:$0xff]  ;;  %v498_v10 = vld [vmem:[#allocation7 + $0x378] sm:$0xff] }
 0x189   :  { %2039 = vmatmul.mubr.bf16.vlgmr.msra.gmra.mrb[4].mxu0 %v3851_v23  ;;  %2121 = vmatmul.mubr.bf16.vlgmr.msra.gmra.mrb[4].mxu1 %v3851_v23 }
 0x18a   :  { %2130 = vmatpush1.bf16.msra.mxu0 %v3042_v27  ;;  %2161 = vmatprep.mubr.bf16.mxu0 %v3829_v63  ;;  %v3098_v27 = vcombine.low %v445_v15, %v449_v16  ;;  %v501_v15 = vld [vmem:[#allocation7 + $0x390] sm:$0xff] }
 0x18b   :  { %2212 = vmatpush1.bf16.msra.mxu1 %v3044_v28  ;;  %2243 = vmatprep.mubr.bf16.mxu1 %v3829_v63  ;;  %v422_v63 = vld [vmem:[#allocation7 + $0x118] sm:$0xff]  ;;  %v3100_v28 = vcombine.low %v446_v17, %v450_v18  ;;  %v505_v16 = vld [vmem:[#allocation7 + $0x3b0] sm:$0xff] }
 0x18c   :  { %2131 = vmatprep.subr.bf16.mxu0 %v3051_v29  ;;  %2213 = vmatprep.subr.bf16.mxu1 %v3053_v31  ;;  %v3077_v59 = vcombine.high %v422_v63, %v426_v55  ;;  %v3076_v4 = vcombine.low %v422_v63, %v426_v55  ;;  %v3107_v29 = vcombine.high %v453_v22, %v457_v24  ;;  %v478_v63 = vld [vmem:[#allocation7 + $0x2d8] sm:$0xff] }
 0x18d   :  { %v3109_v31 = vcombine.high %v454_v25, %v458_v26  ;;  %v482_v55 = vld [vmem:[#allocation7 + $0x2f8] sm:$0xff] }
 0x18e   :  { %2132 = vmatpush1.bf16.msra.mxu0 %v3050_v36  ;;  %v3106_v36 = vcombine.low %v453_v22, %v457_v24  ;;  %v502_v17 = vld [vmem:[#allocation7 + $0x398] sm:$0xff]  ;;  %v509_v22 = vld [vmem:[#allocation7 + $0x3d0] sm:$0xff] }
 0x18f   :  { %2214 = vmatpush1.bf16.msra.mxu1 %v3052_v37  ;;  %2133 = vmatprep.subr.bf16.mxu0 %v3059_v38  ;;  %v3108_v37 = vcombine.low %v454_v25, %v458_v26  ;;  %v3115_v38 = vcombine.high %v461_v32, %v465_v33  ;;  %v506_v18 = vld [vmem:[#allocation7 + $0x3b8] sm:$0xff]  ;;  %v513_v24 = vld [vmem:[#allocation7 + $0x3f0] sm:$0xff] }
 0x190   :  { %2215 = vmatprep.subr.bf16.mxu1 %v3061_v39  ;;  %v3117_v39 = vcombine.high %v462_v34, %v466_v35  ;;  %v510_v25 = vld [vmem:[#allocation7 + $0x3d8] sm:$0xff] }
 0x191   :  { %v514_v26 = vld [vmem:[#allocation7 + $0x3f8] sm:$0xff] }
 0x192   :  { %2134 = vmatpush1.bf16.msra.mxu0 %v3058_v48  ;;  %v3114_v48 = vcombine.low %v461_v32, %v465_v33  ;;  %v517_v32 = vld [vmem:[#allocation7 + $0x410] sm:$0xff] }
 0x193   :  { %2216 = vmatpush1.bf16.msra.mxu1 %v3060_v49  ;;  %2135 = vmatprep.subr.bf16.mxu0 %v3067_v50  ;;  %v3116_v49 = vcombine.low %v462_v34, %v466_v35  ;;  %v3123_v50 = vcombine.high %v469_v40, %v473_v41  ;;  %v521_v33 = vld [vmem:[#allocation7 + $0x430] sm:$0xff]  ;;  %v518_v34 = vld [vmem:[#allocation7 + $0x418] sm:$0xff] }
 0x194   :  { %2217 = vmatprep.subr.bf16.mxu1 %v3069_v51  ;;  %v3125_v51 = vcombine.high %v470_v42, %v474_v43  ;;  %v522_v35 = vld [vmem:[#allocation7 + $0x438] sm:$0xff] }
 0x196   :  { %2136 = vmatpush1.bf16.msra.mxu0 %v3066_v56  ;;  %v3122_v56 = vcombine.low %v469_v40, %v473_v41  ;;  %v525_v40 = vld [vmem:[#allocation7 + $0x450] sm:$0xff] }
 0x197   :  { %2218 = vmatpush1.bf16.msra.mxu1 %v3068_v57  ;;  %2137 = vmatprep.subr.bf16.mxu0 %v3075_v58  ;;  %v3124_v57 = vcombine.low %v470_v42, %v474_v43  ;;  %v3131_v58 = vcombine.high %v477_v53, %v481_v54  ;;  %v529_v41 = vld [vmem:[#allocation7 + $0x470] sm:$0xff]  ;;  %v3170_v42 = vcombine.low %v517_v32, %v521_v33  ;;  %v526_v43 = vld [vmem:[#allocation7 + $0x458] sm:$0xff] }
 0x198   :  { %2219 = vmatprep.subr.bf16.mxu1 %v3077_v59  ;;  %v3133_v59 = vcombine.high %v478_v63, %v482_v55 }
 0x19a   :  { %2138 = vmatpush1.bf16.msra.mxu0 %v3074_v3  ;;  %v3130_v3 = vcombine.low %v477_v53, %v481_v54  ;;  %v537_v53 = vld [vmem:[#allocation7 + $0x4b0] sm:$0xff] }
 0x19b   :  { %2220 = vmatpush1.bf16.msra.mxu1 %v3076_v4  ;;  %2139 = vmatprep.subr.bf16.mxu0 %v3083_v5  ;;  %v3132_v4 = vcombine.low %v478_v63, %v482_v55  ;;  %v3139_v5 = vcombine.high %v485_v60, %v489_v61  ;;  %v534_v63 = vld [vmem:[#allocation7 + $0x498] sm:$0xff] }
 0x19c   :  { %2221 = vmatprep.subr.bf16.mxu1 %v3085_v6  ;;  %v3141_v6 = vcombine.high %v486_v1, %v490_v2  ;;  %v538_v55 = vld [vmem:[#allocation7 + $0x4b8] sm:$0xff] }
 0x19e   :  { %2140 = vmatpush1.bf16.msra.mxu0 %v3082_v11  ;;  %v3138_v11 = vcombine.low %v485_v60, %v489_v61  ;;  %v541_v60 = vld [vmem:[#allocation7 + $0x4d0] sm:$0xff] }
 0x19f   :  { %2222 = vmatpush1.bf16.msra.mxu1 %v3084_v46  ;;  %2141 = vmatprep.subr.bf16.mxu0 %v3091_v12  ;;  %v3140_v46 = vcombine.low %v486_v1, %v490_v2  ;;  %v3147_v12 = vcombine.high %v493_v7, %v497_v8  ;;  %v545_v61 = vld [vmem:[#allocation7 + $0x4f0] sm:$0xff]  ;;  %v542_v1 = vld [vmem:[#allocation7 + $0x4d8] sm:$0xff] }
 0x1a0   :  { %2223 = vmatprep.subr.bf16.mxu1 %v3093_v14  ;;  %v3149_v14 = vcombine.high %v494_v9, %v498_v10  ;;  %v546_v2 = vld [vmem:[#allocation7 + $0x4f8] sm:$0xff] }
 0x1a2   :  { %2142 = vmatpush1.bf16.msra.mxu0 %v3090_v19  ;;  %v3146_v19 = vcombine.low %v493_v7, %v497_v8  ;;  %v553_v7 = vld [vmem:[#allocation7 + $0x530] sm:$0xff]  ;;  %v550_v8 = vld [vmem:[#allocation7 + $0x518] sm:$0xff] }
 0x1a3   :  { %2224 = vmatpush1.bf16.msra.mxu1 %v3092_v20  ;;  %2143 = vmatprep.subr.bf16.mxu0 %v3099_v13  ;;  %v3148_v20 = vcombine.low %v494_v9, %v498_v10  ;;  %v3155_v13 = vcombine.high %v501_v15, %v505_v16  ;;  %v554_v9 = vld [vmem:[#allocation7 + $0x538] sm:$0xff]  ;;  %v3196_v10 = vcombine.low %v542_v1, %v546_v2 }
 0x1a4   :  { %2225 = vmatprep.subr.bf16.mxu1 %v3101_v21  ;;  %v3157_v21 = vcombine.high %v502_v17, %v506_v18 }
 0x1a6   :  { %2144 = vmatpush1.bf16.msra.mxu0 %v3098_v27  ;;  %v3154_v27 = vcombine.low %v501_v15, %v505_v16  ;;  %v558_v15 = vld [vmem:[#allocation7 + $0x558] sm:$0xff] }
 0x1a7   :  { %2226 = vmatpush1.bf16.msra.mxu1 %v3100_v28  ;;  %2145 = vmatprep.subr.bf16.mxu0 %v3107_v29  ;;  %v3156_v28 = vcombine.low %v502_v17, %v506_v18  ;;  %v3163_v29 = vcombine.high %v509_v22, %v513_v24  ;;  %v562_v16 = vld [vmem:[#allocation7 + $0x578] sm:$0xff]  ;;  %v3204_v18 = vcombine.low %v550_v8, %v554_v9 }
 0x1a8   :  { %2227 = vmatprep.subr.bf16.mxu1 %v3109_v31  ;;  %v3165_v31 = vcombine.high %v510_v25, %v514_v26 }
 0x1aa   :  { %2146 = vmatpush1.bf16.msra.mxu0 %v3106_v36  ;;  %v3162_v36 = vcombine.low %v509_v22, %v513_v24  ;;  %v566_v22 = vld [vmem:[#allocation7 + $0x598] sm:$0xff] }
 0x1ab   :  { %2228 = vmatpush1.bf16.msra.mxu1 %v3108_v37  ;;  %2147 = vmatprep.subr.bf16.mxu0 %v3115_v38  ;;  %v3164_v37 = vcombine.low %v510_v25, %v514_v26  ;;  %v3171_v38 = vcombine.high %v517_v32, %v521_v33  ;;  %v570_v24 = vld [vmem:[#allocation7 + $0x5b8] sm:$0xff]  ;;  %v3212_v26 = vcombine.low %v558_v15, %v562_v16 }
 0x1ac   :  { %2229 = vmatprep.subr.bf16.mxu1 %v3117_v39  ;;  %v3173_v39 = vcombine.high %v518_v34, %v522_v35  ;;  %v574_v32 = vld [vmem:[#allocation7 + $0x5d8] sm:$0xff] }
 0x1ad   :  { %v578_v33 = vld [vmem:[#allocation7 + $0x5f8] sm:$0xff] }
 0x1ae   :  { %2148 = vmatpush1.bf16.msra.mxu0 %v3114_v48  ;;  %v530_v48 = vld [vmem:[#allocation7 + $0x478] sm:$0xff] }
 0x1af   :  { %2230 = vmatpush1.bf16.msra.mxu1 %v3116_v49  ;;  %2149 = vmatprep.subr.bf16.mxu0 %v3123_v50  ;;  %v3172_v49 = vcombine.low %v518_v34, %v522_v35  ;;  %v3179_v50 = vcombine.high %v525_v40, %v529_v41  ;;  %v3181_v54 = vcombine.high %v526_v43, %v530_v48 }
 0x1b0   :  { %2231 = vmatprep.subr.bf16.mxu1 %v3125_v51  ;;  %v533_v51 = vld [vmem:[#allocation7 + $0x490] sm:$0xff]  ;;  %v3220_v35 = vcombine.low %v566_v22, %v570_v24 }
 0x1b2   :  { %2150 = vmatpush1.bf16.msra.mxu0 %v3122_v56  ;;  %v3178_v56 = vcombine.low %v525_v40, %v529_v41  ;;  %v582_v40 = vld [vmem:[#allocation7 + $0x618] sm:$0xff] }
 0x1b3   :  { %2232 = vmatpush1.bf16.msra.mxu1 %v3124_v57  ;;  %2151 = vmatprep.subr.bf16.mxu0 %v3131_v58  ;;  %v3180_v57 = vcombine.low %v526_v43, %v530_v48  ;;  %v3187_v58 = vcombine.high %v533_v51, %v537_v53  ;;  %v586_v41 = vld [vmem:[#allocation7 + $0x638] sm:$0xff]  ;;  %v3228_v43 = vcombine.low %v574_v32, %v578_v33 }
 0x1b4   :  { %2233 = vmatprep.subr.bf16.mxu1 %v3133_v59  ;;  %v3189_v59 = vcombine.high %v534_v63, %v538_v55 }
 0x1b6   :  { %2152 = vmatpush1.bf16.msra.mxu0 %v3130_v3  ;;  %v3186_v3 = vcombine.low %v533_v51, %v537_v53  ;;  %v593_v51 = vld [vmem:[#allocation7 + $0x670] sm:$0xff]  ;;  %v590_v53 = vld [vmem:[#allocation7 + $0x658] sm:$0xff] }
 0x1b7   :  { %2234 = vmatpush1.bf16.msra.mxu1 %v3132_v4  ;;  %2153 = vmatprep.subr.bf16.mxu0 %v3139_v5  ;;  %v3195_v4 = vcombine.high %v541_v60, %v545_v61  ;;  %v3197_v5 = vcombine.high %v542_v1, %v546_v2 }
 0x1b8   :  { %2235 = vmatprep.subr.bf16.mxu1 %v3141_v6  ;;  %v549_v6 = vld [vmem:[#allocation7 + $0x510] sm:$0xff] }
 0x1b9   :  { %v3202_v17 = vcombine.low %v549_v6, %v553_v7 }
 0x1ba   :  { %2154 = vmatpush1.bf16.msra.mxu0 %v3138_v11  ;;  %v3203_v11 = vcombine.high %v549_v6, %v553_v7  ;;  %v606_v6 = vld [vmem:[#allocation7 + $0x6d8] sm:$0xff] }
 0x1bb   :  { %2236 = vmatpush1.bf16.msra.mxu1 %v3140_v46  ;;  %2155 = vmatprep.subr.bf16.mxu0 %v3147_v12  ;;  %v3205_v46 = vcombine.high %v550_v8, %v554_v9  ;;  %v557_v12 = vld [vmem:[#allocation7 + $0x550] sm:$0xff]  ;;  %v610_v7 = vld [vmem:[#allocation7 + $0x6f8] sm:$0xff] }
 0x1bc   :  { %2237 = vmatprep.subr.bf16.mxu1 %v3149_v14  ;;  %v561_v14 = vld [vmem:[#allocation7 + $0x570] sm:$0xff] }
 0x1bd   :  { %v3210_v25 = vcombine.low %v557_v12, %v561_v14 }
 0x1be   :  { %2156 = vmatpush1.bf16.msra.mxu0 %v3146_v19  ;;  %v3211_v19 = vcombine.high %v557_v12, %v561_v14  ;;  %v614_v12 = vld [vmem:[#allocation7 + $0x718] sm:$0xff] }
 0x1bf   :  { %2238 = vmatpush1.bf16.msra.mxu1 %v3148_v20  ;;  %2157 = vmatprep.subr.bf16.mxu0 %v3155_v13  ;;  %v3213_v20 = vcombine.high %v558_v15, %v562_v16  ;;  %v565_v13 = vld [vmem:[#allocation7 + $0x590] sm:$0xff]  ;;  %v618_v14 = vld [vmem:[#allocation7 + $0x738] sm:$0xff]  ;;  %v3260_v16 = vcombine.low %v606_v6, %v610_v7 }
 0x1c0   :  { %2239 = vmatprep.subr.bf16.mxu1 %v3157_v21  ;;  %v569_v21 = vld [vmem:[#allocation7 + $0x5b0] sm:$0xff] }
 0x1c1   :  { %v3218_v34 = vcombine.low %v565_v13, %v569_v21 }
 0x1c2   :  { %2158 = vmatpush1.bf16.msra.mxu0 %v3154_v27  ;;  %v3219_v27 = vcombine.high %v565_v13, %v569_v21  ;;  %v622_v13 = vld [vmem:[#allocation7 + $0x758] sm:$0xff] }
 0x1c3   :  { %2240 = vmatpush1.bf16.msra.mxu1 %v3156_v28  ;;  %2159 = vmatprep.subr.bf16.mxu0 %v3163_v29  ;;  %v3221_v28 = vcombine.high %v566_v22, %v570_v24  ;;  %v573_v29 = vld [vmem:[#allocation7 + $0x5d0] sm:$0xff]  ;;  %v626_v21 = vld [vmem:[#allocation7 + $0x778] sm:$0xff]  ;;  %v3268_v24 = vcombine.low %v614_v12, %v618_v14 }
 0x1c4   :  { %2241 = vmatprep.subr.bf16.mxu1 %v3165_v31  ;;  %v577_v31 = vld [vmem:[#allocation7 + $0x5f0] sm:$0xff] }
 0x1c6   :  { %2160 = vmatpush1.bf16.msra.mxu0 %v3162_v36  ;;  %v3227_v36 = vcombine.high %v573_v29, %v577_v31 }
 0x1c7   :  { %2242 = vmatpush1.bf16.msra.mxu1 %v3164_v37  ;;  %2170 = vmatprep.subr.bf16.mxu0 %v3171_v38  ;;  %v3229_v37 = vcombine.high %v574_v32, %v578_v33  ;;  %v581_v38 = vld [vmem:[#allocation7 + $0x610] sm:$0xff]  ;;  %v3276_v33 = vcombine.low %v622_v13, %v626_v21 }
 0x1c8   :  { %2252 = vmatprep.subr.bf16.mxu1 %v3173_v39  ;;  %v585_v39 = vld [vmem:[#allocation7 + $0x630] sm:$0xff] }
 0x1c9   :  { %2162 = vmatmul.mubr.bf16.vlgmr.msra.gmra.mrb[8].mxu0 %v3831_v0  ;;  %v3235_v48 = vcombine.high %v581_v38, %v585_v39 }
 0x1ca   :  { %2244 = vmatmul.mubr.bf16.vlgmr.msra.gmra.mrb[8].mxu1 %v3831_v0  ;;  %2171 = vmatpush1.bf16.msra.mxu0 %v3170_v42  ;;  %v3188_v0 = vcombine.low %v534_v63, %v538_v55  ;;  %v3226_v42 = vcombine.low %v573_v29, %v577_v31  ;;  %v3234_v63 = vcombine.low %v581_v38, %v585_v39  ;;  %v630_v29 = vld [vmem:[#allocation7 + $0x798] sm:$0xff] }
 0x1cb   :  { %2202 = vmatprep.mubr.bf16.mxu0 %v3842_v30  ;;  %2253 = vmatpush1.bf16.msra.mxu1 %v3172_v49  ;;  %v3237_v49 = vcombine.high %v582_v40, %v586_v41  ;;  %v3236_v55 = vcombine.low %v582_v40, %v586_v41  ;;  %v634_v31 = vld [vmem:[#allocation7 + $0x7b8] sm:$0xff] }
 0x1cc   :  { %2284 = vmatprep.mubr.bf16.mxu1 %v3842_v30  ;;  %2172 = vmatprep.subr.bf16.mxu0 %v3179_v50  ;;  %v3194_v30 = vcombine.low %v541_v60, %v545_v61  ;;  %v589_v50 = vld [vmem:[#allocation7 + $0x650] sm:$0xff]  ;;  %v598_v60 = vld [vmem:[#allocation7 + $0x698] sm:$0xff]  ;;  %v3284_v41 = vcombine.low %v630_v29, %v634_v31 }
 0x1cd   :  { %2254 = vmatprep.subr.bf16.mxu1 %v3181_v54  ;;  %v594_v54 = vld [vmem:[#allocation7 + $0x678] sm:$0xff]  ;;  %v3242_v1 = vcombine.low %v589_v50, %v593_v51 }
 0x1ce   :  { %2173 = vmatpush1.bf16.msra.mxu0 %v3178_v56  ;;  %v3243_v56 = vcombine.high %v589_v50, %v593_v51  ;;  %v602_v61 = vld [vmem:[#allocation7 + $0x6b8] sm:$0xff]  ;;  %v3244_v2 = vcombine.low %v590_v53, %v594_v54  ;;  %v3531_v50 = vld [vmem:[#allocation8 + $0x40] sm:$0xff]  }
 0x1cf   :  { %2255 = vmatpush1.bf16.msra.mxu1 %v3180_v57  ;;  %2174 = vmatprep.subr.bf16.mxu0 %v3187_v58  ;;  %v3245_v57 = vcombine.high %v590_v53, %v594_v54  ;;  %v597_v58 = vld [vmem:[#allocation7 + $0x690] sm:$0xff]  ;;  %v3252_v9 = vcombine.low %v598_v60, %v602_v61  ;;  %v638_v38 = vld [vmem:[#allocation7 + $0x7d8] sm:$0xff]  ;;  %v3532_v51 = vld [vmem:[#allocation8 + $0xc0] sm:$0xff]  }
 0x1d0   :  { %2256 = vmatprep.subr.bf16.mxu1 %v3189_v59  ;;  %v601_v59 = vld [vmem:[#allocation7 + $0x6b0] sm:$0xff]  ;;  %v642_v39 = vld [vmem:[#allocation7 + $0x7f8] sm:$0xff]  ;;  %v3533_v53 = vld [vmem:[#allocation8] sm:$0xff]  }
 0x1d1   :  { %v3250_v8 = vcombine.low %v597_v58, %v601_v59  ;;  %v3534_v54 = vld [vmem:[#allocation8 + $0x80] sm:$0xff]  }
 0x1d2   :  { %2175 = vmatpush1.bf16.msra.mxu0 %v3186_v3  ;;  %v3251_v3 = vcombine.high %v597_v58, %v601_v59  ;;  %v3539_v58 = vld [vmem:[#allocation8 + $0x50] sm:$0xff]  }
 0x1d3   :  { %2257 = vmatpush1.bf16.msra.mxu1 %v3188_v0  ;;  %2176 = vmatprep.subr.bf16.mxu0 %v3195_v4  ;;  %v3253_v0 = vcombine.high %v598_v60, %v602_v61  ;;  %v605_v4 = vld [vmem:[#allocation7 + $0x6d0] sm:$0xff] }
 0x1d4   :  { %2258 = vmatprep.subr.bf16.mxu1 %v3197_v5  ;;  %v609_v5 = vld [vmem:[#allocation7 + $0x6f0] sm:$0xff] }
 0x1d5   :  { %v3258_v15 = vcombine.low %v605_v4, %v609_v5  ;;  %v3540_v59 = vld [vmem:[#allocation8 + $0xd0] sm:$0xff]  }
 0x1d6   :  { %2177 = vmatpush1.bf16.msra.mxu0 %v3194_v30  ;;  %v3259_v30 = vcombine.high %v605_v4, %v609_v5  ;;  %v3541_v60 = vld [vmem:[#allocation8 + $0x10] sm:$0xff]   ;;  %v3548_v4 = vld [vmem:[#allocation8 + $0xe0] sm:$0xff]  }
 0x1d7   :  { %2259 = vmatpush1.bf16.msra.mxu1 %v3196_v10  ;;  %2178 = vmatprep.subr.bf16.mxu0 %v3203_v11  ;;  %v3261_v10 = vcombine.high %v606_v6, %v610_v7  ;;  %v613_v11 = vld [vmem:[#allocation7 + $0x710] sm:$0xff]  ;;  %v3549_v5 = vld [vmem:[#allocation8 + $0x20] sm:$0xff]   ;;  %v3551_v7 = vld [vmem:[#allocation8 + $0x68] sm:$0xff]  }
 0x1d8   :  { %2260 = vmatprep.subr.bf16.mxu1 %v3205_v46  ;;  %v617_v46 = vld [vmem:[#allocation7 + $0x730] sm:$0xff]  ;;  %v3550_v6 = vld [vmem:[#allocation8 + $0xa0] sm:$0xff]  }
 0x1d9   :  { %v3266_v22 = vcombine.low %v613_v11, %v617_v46  ;;  %v3542_v61 = vld [vmem:[#allocation8 + $0x90] sm:$0xff]  }
 0x1da   :  { %2179 = vmatpush1.bf16.msra.mxu0 %v3202_v17  ;;  %v3267_v17 = vcombine.high %v613_v11, %v617_v46  ;;  %v3556_v11 = vld [vmem:[#allocation8 + $0xf0] sm:$0xff]  }
 0x1db   :  { %2261 = vmatpush1.bf16.msra.mxu1 %v3204_v18  ;;  %2180 = vmatprep.subr.bf16.mxu0 %v3211_v19  ;;  %v3269_v18 = vcombine.high %v614_v12, %v618_v14  ;;  %v621_v19 = vld [vmem:[#allocation7 + $0x750] sm:$0xff]  ;;  %v3559_v14 = vld [vmem:[#allocation8 + $0x78] sm:$0xff]  }
 0x1dc   :  { %2262 = vmatprep.subr.bf16.mxu1 %v3213_v20  ;;  %v625_v20 = vld [vmem:[#allocation7 + $0x770] sm:$0xff] }
 0x1dd   :  { %v3274_v32 = vcombine.low %v621_v19, %v625_v20  ;;  %v3557_v46 = vld [vmem:[#allocation8 + $0x30] sm:$0xff]  }
 0x1de   :  { %2181 = vmatpush1.bf16.msra.mxu0 %v3210_v25  ;;  %v3275_v25 = vcombine.high %v621_v19, %v625_v20  ;;  %v3558_v12 = vld [vmem:[#allocation8 + $0xb0] sm:$0xff]   ;;  %v3564_v19 = vld [vmem:[#allocation8 + $0x1c0] sm:$0xff]   ;;  %v3866_v20 = vld [vmem:[%s3907_s4] sm:$0xff] }
 0x1df   :  { %2263 = vmatpush1.bf16.msra.mxu1 %v3212_v26  ;;  %2182 = vmatprep.subr.bf16.mxu0 %v3219_v27  ;;  %v3277_v26 = vcombine.high %v622_v13, %v626_v21  ;;  %v629_v27 = vld [vmem:[#allocation7 + $0x790] sm:$0xff]  ;;  %v648_v13 = vrot.slane %v3866_v20, %v119_v45  ;;  %v656_v21 = vrot.slane %v3866_v20, %v127_v52 }
 0x1e0   :  { %2264 = vmatprep.subr.bf16.mxu1 %v3221_v28  ;;  %v633_v28 = vld [vmem:[#allocation7 + $0x7b0] sm:$0xff] }
 0x1e1   :  { %v3282_v40 = vcombine.low %v629_v27, %v633_v28 }
 0x1e2   :  { %2183 = vmatpush1.bf16.msra.mxu0 %v3218_v34  ;;  %v3283_v34 = vcombine.high %v629_v27, %v633_v28 }
 0x1e3   :  { %2265 = vmatpush1.bf16.msra.mxu1 %v3220_v35  ;;  %2184 = vmatprep.subr.bf16.mxu0 %v3227_v36  ;;  %v3285_v35 = vcombine.high %v630_v29, %v634_v31  ;;  %v637_v36 = vld [vmem:[#allocation7 + $0x7d0] sm:$0xff] }
 0x1e4   :  { %2266 = vmatprep.subr.bf16.mxu1 %v3229_v37  ;;  %v641_v37 = vld [vmem:[#allocation7 + $0x7f0] sm:$0xff] }
 0x1e6   :  { %2185 = vmatpush1.bf16.msra.mxu0 %v3226_v42  ;;  %v3291_v42 = vcombine.high %v637_v36, %v641_v37 }
 0x1e7   :  { %2267 = vmatpush1.bf16.msra.mxu1 %v3228_v43  ;;  %2186 = vmatprep.subr.bf16.mxu0 %v3235_v48  ;;  %v3293_v43 = vcombine.high %v638_v38, %v642_v39  ;;  %v3290_v48 = vcombine.low %v637_v36, %v641_v37 }
 0x1e8   :  { %2268 = vmatprep.subr.bf16.mxu1 %v3237_v49  ;;  %v3292_v49 = vcombine.low %v638_v38, %v642_v39 }
 0x1ea   :  { %2187 = vmatpush1.bf16.msra.mxu0 %v3234_v63  ;;  %v3535_v63 = vld [vmem:[#allocation8 + $0x48] sm:$0xff]  }
 0x1eb   :  { %2269 = vmatpush1.bf16.msra.mxu1 %v3236_v55  ;;  %2188 = vmatprep.subr.bf16.mxu0 %v3243_v56  ;;  %v3536_v55 = vld [vmem:[#allocation8 + $0xc8] sm:$0xff]  }
 0x1ec   :  { %2270 = vmatprep.subr.bf16.mxu1 %v3245_v57  ;;  %v3537_v56 = vld [vmem:[#allocation8 + $0x8] sm:$0xff]  }
 0x1ed   :  { %v3538_v57 = vld [vmem:[#allocation8 + $0x88] sm:$0xff]  }
 0x1ee   :  { %2189 = vmatpush1.bf16.msra.mxu0 %v3242_v1  ;;  %v3543_v1 = vld [vmem:[#allocation8 + $0x58] sm:$0xff]  }
 0x1ef   :  { %2271 = vmatpush1.bf16.msra.mxu1 %v3244_v2  ;;  %2190 = vmatprep.subr.bf16.mxu0 %v3251_v3  ;;  %v3544_v2 = vld [vmem:[#allocation8 + $0xd8] sm:$0xff]  }
 0x1f0   :  { %2272 = vmatprep.subr.bf16.mxu1 %v3253_v0  ;;  %v3545_v3 = vld [vmem:[#allocation8 + $0x18] sm:$0xff]   ;;  %v3547_v0 = vld [vmem:[#allocation8 + $0x60] sm:$0xff]  }
 0x1f2   :  { %2191 = vmatpush1.bf16.msra.mxu0 %v3250_v8  ;;  %v3552_v8 = vld [vmem:[#allocation8 + $0xe8] sm:$0xff]  }
 0x1f3   :  { %2273 = vmatpush1.bf16.msra.mxu1 %v3252_v9  ;;  %2192 = vmatprep.subr.bf16.mxu0 %v3259_v30  ;;  %v3553_v9 = vld [vmem:[#allocation8 + $0x28] sm:$0xff]  }
 0x1f4   :  { %2274 = vmatprep.subr.bf16.mxu1 %v3261_v10  ;;  %v3554_v30 = vld [vmem:[#allocation8 + $0xa8] sm:$0xff]   ;;  %v3555_v10 = vld [vmem:[#allocation8 + $0x70] sm:$0xff]  }
 0x1f6   :  { %2193 = vmatpush1.bf16.msra.mxu0 %v3258_v15  ;;  %v3560_v15 = vld [vmem:[#allocation8 + $0xf8] sm:$0xff]  }
 0x1f7   :  { %2275 = vmatpush1.bf16.msra.mxu1 %v3260_v16  ;;  %2194 = vmatprep.subr.bf16.mxu0 %v3267_v17  ;;  %v3561_v16 = vld [vmem:[#allocation8 + $0x38] sm:$0xff]  }
 0x1f8   :  { %2276 = vmatprep.subr.bf16.mxu1 %v3269_v18  ;;  %v3562_v17 = vld [vmem:[#allocation8 + $0xb8] sm:$0xff]   ;;  %v3563_v18 = vld [vmem:[#allocation8 + $0x140] sm:$0xff]  }
 0x1fa   :  { %2195 = vmatpush1.bf16.msra.mxu0 %v3266_v22  ;;  %v652_v22 = vrot.slane %v3866_v20, %v123_v47 }
 0x1fb   :  { %2277 = vmatpush1.bf16.msra.mxu1 %v3268_v24  ;;  %2196 = vmatprep.subr.bf16.mxu0 %v3275_v25  ;;  %v660_v24 = vrot.slane %v3866_v20, %v131_v62  ;;  %v3566_v62 = vld [vmem:[#allocation8 + $0x180] sm:$0xff]  }
 0x1fc   :  { %2278 = vmatprep.subr.bf16.mxu1 %v3277_v26 }
 0x1fe   :  { %2197 = vmatpush1.bf16.msra.mxu0 %v3274_v32 }
 0x1ff   :  { %2279 = vmatpush1.bf16.msra.mxu1 %v3276_v33  ;;  %2198 = vmatprep.subr.bf16.mxu0 %v3283_v34 }
 0x200   :  { %2280 = vmatprep.subr.bf16.mxu1 %v3285_v35 }
 0x202   :  { %2199 = vmatpush1.bf16.msra.mxu0 %v3282_v40 }
 0x203   :  { %2281 = vmatpush1.bf16.msra.mxu1 %v3284_v41  ;;  %2200 = vmatprep.subr.bf16.mxu0 %v3291_v42  ;;  %v3565_v41 = vld [vmem:[#allocation8 + $0x100] sm:$0xff]  }
 0x204   :  { %2282 = vmatprep.subr.bf16.mxu1 %v3293_v43 }
 0x206   :  { %2201 = vmatpush1.bf16.msra.mxu0 %v3290_v48  ;;  %v3567_v48 = vld [vmem:[#allocation8 + $0x148] sm:$0xff]  }
 0x207   :  { %2283 = vmatpush1.bf16.msra.mxu1 %v3292_v49  ;;  %3359 = vmatprep.subr.bf16.mxu0 %v3531_v50  ;;  %v3568_v49 = vld [vmem:[#allocation8 + $0x1c8] sm:$0xff]  }
 0x208   :  { %3381 = vmatprep.subr.bf16.mxu1 %v3532_v51  ;;  %v3569_v50 = vld [vmem:[#allocation8 + $0x108] sm:$0xff]  }
 0x209   :  { %2203 = vmatmul.mubr.bf16.vlgmr.msra.gmra.mrb[8].mxu0 %v3851_v23  ;;  %v3570_v51 = vld [vmem:[#allocation8 + $0x188] sm:$0xff]  }
 0x20a   :  { %2285 = vmatmul.mubr.bf16.vlgmr.msra.gmra.mrb[8].mxu1 %v3851_v23  ;;  %3360 = vmatpush3.bf16.msra.mxu0 %v3533_v53  ;;  %v3546_v23 = vld [vmem:[#allocation8 + $0x98] sm:$0xff]   ;;  %v3571_v53 = vld [vmem:[#allocation8 + $0x150] sm:$0xff]  }
 0x20b   :  { %3382 = vmatpush3.bf16.msra.mxu1 %v3534_v54  ;;  %3361 = vmatprep.subr.bf16.mxu0 %v3535_v63  ;;  %v3572_v54 = vld [vmem:[#allocation8 + $0x1d0] sm:$0xff]  }
 0x20c   :  { %3383 = vmatprep.subr.bf16.mxu1 %v3536_v55  ;;  %v3573_v63 = vld [vmem:[#allocation8 + $0x110] sm:$0xff]  }
 0x20d   :  { %v3574_v55 = vld [vmem:[#allocation8 + $0x190] sm:$0xff]  }
 0x20e   :  { %3362 = vmatpush3.bf16.msra.mxu0 %v3537_v56  ;;  %v3575_v56 = vld [vmem:[#allocation8 + $0x158] sm:$0xff]  }
 0x20f   :  { %3384 = vmatpush3.bf16.msra.mxu1 %v3538_v57  ;;  %3363 = vmatprep.subr.bf16.mxu0 %v3539_v58  ;;  %v3576_v57 = vld [vmem:[#allocation8 + $0x1d8] sm:$0xff]  }
 0x210   :  { %3385 = vmatprep.subr.bf16.mxu1 %v3540_v59  ;;  %v3577_v58 = vld [vmem:[#allocation8 + $0x118] sm:$0xff]  }
 0x211   :  { %v3578_v59 = vld [vmem:[#allocation8 + $0x198] sm:$0xff]  }
 0x212   :  { %3364 = vmatpush3.bf16.msra.mxu0 %v3541_v60  ;;  %v3579_v60 = vld [vmem:[#allocation8 + $0x160] sm:$0xff]  }
 0x213   :  { %3386 = vmatpush3.bf16.msra.mxu1 %v3542_v61  ;;  %3365 = vmatprep.subr.bf16.mxu0 %v3543_v1  ;;  %v3580_v61 = vld [vmem:[#allocation8 + $0x1e0] sm:$0xff]  }
 0x214   :  { %3387 = vmatprep.subr.bf16.mxu1 %v3544_v2  ;;  %v3581_v1 = vld [vmem:[#allocation8 + $0x120] sm:$0xff]  }
 0x215   :  { %v3582_v2 = vld [vmem:[#allocation8 + $0x1a0] sm:$0xff]  }
 0x216   :  { %3366 = vmatpush3.bf16.msra.mxu0 %v3545_v3  ;;  %v3583_v3 = vld [vmem:[#allocation8 + $0x168] sm:$0xff]  }
 0x217   :  { %3388 = vmatpush3.bf16.msra.mxu1 %v3546_v23  ;;  %3367 = vmatprep.subr.bf16.mxu0 %v3547_v0  ;;  %v3584_v23 = vld [vmem:[#allocation8 + $0x1e8] sm:$0xff]  }
 0x218   :  { %3389 = vmatprep.subr.bf16.mxu1 %v3548_v4  ;;  %v3585_v0 = vld [vmem:[#allocation8 + $0x128] sm:$0xff]  }
 0x219   :  { %v3586_v4 = vld [vmem:[#allocation8 + $0x1a8] sm:$0xff]  }
 0x21a   :  { %3368 = vmatpush3.bf16.msra.mxu0 %v3549_v5  ;;  %v3587_v5 = vld [vmem:[#allocation8 + $0x170] sm:$0xff]  }
 0x21b   :  { %3390 = vmatpush3.bf16.msra.mxu1 %v3550_v6  ;;  %3369 = vmatprep.subr.bf16.mxu0 %v3551_v7  ;;  %v3588_v6 = vld [vmem:[#allocation8 + $0x1f0] sm:$0xff]  }
 0x21c   :  { %3391 = vmatprep.subr.bf16.mxu1 %v3552_v8  ;;  %v3589_v7 = vld [vmem:[#allocation8 + $0x130] sm:$0xff]  }
 0x21d   :  { %v3590_v8 = vld [vmem:[#allocation8 + $0x1b0] sm:$0xff]  }
 0x21e   :  { %3370 = vmatpush3.bf16.msra.mxu0 %v3553_v9  ;;  %v3591_v9 = vld [vmem:[#allocation8 + $0x178] sm:$0xff]  }
 0x21f   :  { %3392 = vmatpush3.bf16.msra.mxu1 %v3554_v30  ;;  %3371 = vmatprep.subr.bf16.mxu0 %v3555_v10  ;;  %v3592_v30 = vld [vmem:[#allocation8 + $0x1f8] sm:$0xff]  }
 0x220   :  { %3393 = vmatprep.subr.bf16.mxu1 %v3556_v11  ;;  %v3593_v10 = vld [vmem:[#allocation8 + $0x138] sm:$0xff]  }
 0x221   :  { %v3594_v11 = vld [vmem:[#allocation8 + $0x1b8] sm:$0xff]  }
 0x222   :  { %3372 = vmatpush3.bf16.msra.mxu0 %v3557_v46  ;;  %v663_v46 = vsub.s32 4, %v3813_v44 }
 0x223   :  { %3394 = vmatpush3.bf16.msra.mxu1 %v3558_v12  ;;  %3373 = vmatprep.subr.bf16.mxu0 %v3559_v14  ;;  %v671_v12 = vsub.s32 6, %v3813_v44  ;;  %v667_v14 = vsub.s32 5, %v3813_v44 }
 0x224   :  { %3395 = vmatprep.subr.bf16.mxu1 %v3560_v15  ;;  %v675_v15 = vsub.s32 7, %v3813_v44 }
 0x226   :  { %3374 = vmatpush3.bf16.msra.mxu0 %v3561_v16  ;;  %v664_v16 = vrot.slane %v3866_v20, %v663_v46 }
 0x227   :  { %3396 = vmatpush3.bf16.msra.mxu1 %v3562_v17  ;;  %3403 = vmatprep.subr.bf16.mxu0 %v3563_v18  ;;  %v672_v17 = vrot.slane %v3866_v20, %v671_v12  ;;  %v668_v18 = vrot.slane %v3866_v20, %v667_v14 }
 0x228   :  { %3425 = vmatprep.subr.bf16.mxu1 %v3564_v19  ;;  %v676_v19 = vrot.slane %v3866_v20, %v675_v15 }
 0x25c   :  { %v2040_v25 = vpop.f32.mrb[4].mxu0  ;;  %v2122_v26 = vpop.f32.mrb[4].mxu1 }
 0x25d   :  { %v3447_v27 = vadd.f32 %v2040_v25, %v648_v13  ;;  %v3449_v28 = vadd.f32 %v2122_v26, %v656_v21  ;;  %v2042_v29 = vpop.f32.mrb[5].mxu0  ;;  %v2124_v31 = vpop.f32.mrb[5].mxu1 }
 0x25e   :  { %v3448_v32 = vadd.f32 %v2042_v29, %v652_v22  ;;  %v3450_v45 = vadd.f32 %v2124_v31, %v660_v24  ;;  %v2044_v33 = vpop.f32.mrb[6].mxu0  ;;  %v2126_v34 = vpop.f32.mrb[6].mxu1 }
 0x25f   :  { %v2293_v35 = vmax.f32 %v3447_v27, 0.0  ;;  %v2295_v52 = vmax.f32 %v3449_v28, 0.0  ;;  %v2045_v36 = vpop.f32.mrb[7].mxu0  ;;  %v2127_v37 = vpop.f32.mrb[7].mxu1 }
 0x260   :  { %v2294_v38 = vmax.f32 %v3448_v32, 0.0  ;;  %v2296_v47 = vmax.f32 %v3450_v45, 0.0 }
 0x261   :  { %v2301_v42 = vpack.c.bf16 %v2293_v35, %v2293_v35  ;;  %v2303_v43 = vpack.c.bf16 %v2295_v52, %v2295_v52 }
 0x262   :  { %v2302_v39 = vpack.c.bf16 %v2294_v38, %v2294_v38  ;;  %v2304_v40 = vpack.c.bf16 %v2296_v47, %v2296_v47 }
 0x264   :  { %2860 = vmatprep.mubr.bf16.mxu0 %v2302_v39  ;;  %2900 = vmatprep.mubr.bf16.mxu1 %v2304_v40  ;;  %v3294_v39 = vld [vmem:[%s3909_s6] ss:$0 sm:$0xff]  ;;  %s3724_s6 = smov [#allocation10]  }
 0x265   :  { %2861 = vmatmul.mubr.bf16.vlgmr.msra.gmra.mrb[12].mxu0 %v2301_v42  ;;  %2901 = vmatmul.mubr.bf16.vlgmr.msra.gmra.mrb[12].mxu1 %v2303_v43  ;;  %s2995_s8 = sshll.u32 %s3724_s6, 4  ;;  %s2996_s8 = int_to_ptr.vmem [resolvable:$true] %s2995_s8 }
 0x266   :  { %3404 = vmatpush3.bf16.msra.mxu0 %v3565_v41  ;;  %3426 = vmatpush3.bf16.msra.mxu1 %v3566_v62  ;;  %s3683_s9 = scalar_lea.vmem %s2996_s8, 128  ;;  %p3688_p5 = scmp.lt.s32.totalorder %s2996_s8, %s2996_s8 }
 0x267   :  { %3405 = vmatprep.subr.bf16.mxu0 %v3567_v48  ;;  %3427 = vmatprep.subr.bf16.mxu1 %v3568_v49  ;;  %p3684_p4 = scmp.ne.s32.totalorder %s2996_s8, %s3683_s9  ;;  %p3689_p6 = scmp.lt.s32.totalorder %s3683_s9, %s3683_s9 }
 0x269   :  { %p3690_p7 = por %p3689_p6, %p3688_p5 }
 0x26a   :  { %3406 = vmatpush3.bf16.msra.mxu0 %v3569_v50  ;;  %3428 = vmatpush3.bf16.msra.mxu1 %v3570_v51 }
 0x26b   :  { %3407 = vmatprep.subr.bf16.mxu0 %v3571_v53  ;;  %3429 = vmatprep.subr.bf16.mxu1 %v3572_v54  ;;  %p3691_p8 = pnand %p3690_p7, %p3684_p4 }
 0x26e   :  { %3408 = vmatpush3.bf16.msra.mxu0 %v3573_v63  ;;  %3430 = vmatpush3.bf16.msra.mxu1 %v3574_v55 }
 0x26f   :  { %3409 = vmatprep.subr.bf16.mxu0 %v3575_v56  ;;  %3431 = vmatprep.subr.bf16.mxu1 %v3576_v57 }
 0x272   :  { %3410 = vmatpush3.bf16.msra.mxu0 %v3577_v58  ;;  %3432 = vmatpush3.bf16.msra.mxu1 %v3578_v59 }
 0x273   :  { %3411 = vmatprep.subr.bf16.mxu0 %v3579_v60  ;;  %3433 = vmatprep.subr.bf16.mxu1 %v3580_v61 }
 0x276   :  { %3412 = vmatpush3.bf16.msra.mxu0 %v3581_v1  ;;  %3434 = vmatpush3.bf16.msra.mxu1 %v3582_v2 }
 0x277   :  { %3413 = vmatprep.subr.bf16.mxu0 %v3583_v3  ;;  %3435 = vmatprep.subr.bf16.mxu1 %v3584_v23 }
 0x27a   :  { %3414 = vmatpush3.bf16.msra.mxu0 %v3585_v0  ;;  %3436 = vmatpush3.bf16.msra.mxu1 %v3586_v4 }
 0x27b   :  { %3415 = vmatprep.subr.bf16.mxu0 %v3587_v5  ;;  %3437 = vmatprep.subr.bf16.mxu1 %v3588_v6 }
 0x27e   :  { %3416 = vmatpush3.bf16.msra.mxu0 %v3589_v7  ;;  %3438 = vmatpush3.bf16.msra.mxu1 %v3590_v8 }
 0x27f   :  { %3417 = vmatprep.subr.bf16.mxu0 %v3591_v9  ;;  %3439 = vmatprep.subr.bf16.mxu1 %v3592_v30 }
 0x282   :  { %3418 = vmatpush3.bf16.msra.mxu0 %v3593_v10  ;;  %3440 = vmatpush3.bf16.msra.mxu1 %v3594_v11 }
 0x2dc   :  { %v2204_v13 = vpop.f32.mrb[8].mxu0 }
 0x2dd   :  { %v3451_v21 = vadd.f32 %v2204_v13, %v664_v16  ;;  %v2286_v22 = vpop.f32.mrb[8].mxu1  ;;  %v2206_v24 = vpop.f32.mrb[9].mxu0 }
 0x2de   :  { %v3453_v25 = vadd.f32 %v2286_v22, %v672_v17  ;;  %v3452_v26 = vadd.f32 %v2206_v24, %v668_v18  ;;  %v2288_v27 = vpop.f32.mrb[9].mxu1  ;;  %v2208_v28 = vpop.f32.mrb[10].mxu0 }
 0x2df   :  { %v2297_v29 = vmax.f32 %v3451_v21, 0.0  ;;  %v3454_v31 = vadd.f32 %v2288_v27, %v676_v19  ;;  %v2290_v32 = vpop.f32.mrb[10].mxu1  ;;  %v2209_v44 = vpop.f32.mrb[11].mxu0 }
 0x2e0   :  { %v2299_v45 = vmax.f32 %v3453_v25, 0.0  ;;  %v2298_v33 = vmax.f32 %v3452_v26, 0.0  ;;  %v2291_v34 = vpop.f32.mrb[11].mxu1 }
 0x2e1   :  { %v2300_v35 = vmax.f32 %v3454_v31, 0.0  ;;  %v2305_v36 = vpack.c.bf16 %v2297_v29, %v2297_v29 }
 0x2e2   :  { %v2306_v52 = vpack.c.bf16 %v2298_v33, %v2298_v33  ;;  %v2307_v20 = vpack.c.bf16 %v2299_v45, %v2299_v45 }
 0x2e3   :  { %v2308_v37 = vpack.c.bf16 %v2300_v35, %v2300_v35 }
 0x2e4   :  { %2940 = vmatprep.mubr.bf16.mxu0 %v2306_v52 }
 0x2e5   :  { %2980 = vmatprep.mubr.bf16.mxu1 %v2308_v37  ;;  %2941 = vmatmul.mubr.bf16.vlgmr.msra.gmra.mrb[16].mxu0 %v2305_v36 }
 0x2e6   :  { %2981 = vmatmul.mubr.bf16.vlgmr.msra.gmra.mrb[16].mxu1 %v2307_v20 }
 0x338   :  { %v3375_v38 = vpop.f32.mrb[12].mxu0  ;;  %v3397_v47 = vpop.f32.mrb[12].mxu1 }
 0x339   :  { %v3376_v40 = vpop.f32.mrb[13].mxu0  ;;  %v3398_v41 = vpop.f32.mrb[13].mxu1 }
 0x33a   :  { %v3377_v62 = vadd.f32 %v3376_v40, %v3375_v38  ;;  %v3399_v42 = vadd.f32 %v3398_v41, %v3397_v47  ;;  %v3378_v43 = vpop.f32.mrb[14].mxu0  ;;  %v3400_v48 = vpop.f32.mrb[14].mxu1 }
 0x33b   :  { %v3379_v49 = vpop.f32.mrb[15].mxu0  ;;  %v3401_v50 = vpop.f32.mrb[15].mxu1 }
 0x33c   :  { %v2863_v51 = vadd.f32 %v3377_v62, %v3294_v39 }
 0x33e   :  { %v2903_v53 = vadd.f32 %v3399_v42, %v2863_v51 }
 0x3b8   :  { %v3419_v54 = vpop.f32.mrb[16].mxu0 }
 0x3b9   :  { %v3441_v63 = vpop.f32.mrb[16].mxu1  ;;  %v3420_v55 = vpop.f32.mrb[17].mxu0 }
 0x3ba   :  { %v3421_v56 = vadd.f32 %v3420_v55, %v3419_v54  ;;  %v3442_v57 = vpop.f32.mrb[17].mxu1  ;;  %v3422_v58 = vpop.f32.mrb[18].mxu0 }
 0x3bb   :  { %v3443_v59 = vadd.f32 %v3442_v57, %v3441_v63  ;;  %v3444_v60 = vpop.f32.mrb[18].mxu1  ;;  %v3423_v61 = vpop.f32.mrb[19].mxu0 }
 0x3bc   :  { %v2943_v1 = vadd.f32 %v3421_v56, %v2903_v53  ;;  %v3445_v2 = vpop.f32.mrb[19].mxu1 }
 0x3be   :  { %v2983_v3 = vadd.f32 %v3443_v59, %v2943_v1 }
 0x3c0   :  { %2988 = vst [vmem:[#allocation10] sm:$0xff] %v2983_v3 }
 0x3c1   :  { %3694 = shalt.err (!%p3691_p8)
}
 0x3c2   :  { %s3695_s12 = scalar_lea.hbm %s3910_s7, 128 }
 0x3c3   :  { %p3696_p9 = scmp.ne.s32.totalorder %s3910_s7, %s3695_s12  ;;  %p3699_p10 = scmp.lt.u32.totalorder %s3695_s12, %s3910_s7 }
 0x3c5   :  { %p3701_p11 = pnand %p3699_p10, %p3696_p9 }
 0x3c7   :  { %3704 = shalt.err (!%p3701_p11)
}
 0x3c8   :  { %2998 = dma.vmem_to_hbm [thread:$0]  %s2996_s8, 128, %s3910_s7, [#allocation4]  }
 0x3c9   :  { %3711 = dma.done.wait [#allocation4], 128  }
 0x3ca   :  { %3712 = vsyncadd [#allocation4], 4294967168 }
 0x3cb   :  { %3002 = vsyncpa [#allocation3], 1 }
 0x3cc   :  { %3003 = vsyncpa [#allocation6], 1 }
 0x3cd   :  { %3004 = vsyncpa [#allocation9], 1 }
 0x3ce   :  { %3005 = vsyncpa [#allocation4], 1 }

</bundles_post_ra>
